<compile_context>
chip_gen: v6e
topology: v6e:2x2x1
jax: 0.10.0
libtpu: 0.0.40
codegen_flags: <defaults>
</compile_context>

<pallas_src>
import functools

import jax
import jax.numpy as jnp
from jax import lax
from jax.experimental import pallas as pl
from jax.experimental.pallas import tpu as pltpu


def _linear_attention_kernel(
    x_ref, wq_ref, wk_ref, wv_ref, wout_ref, bout_ref, gain_ref,
    bdmask_ref, lmask_ref,
    o_ref,
    ctx_acc, m_scr, l_scr, weff_scr,
    *, heads, dim_head, scale, eps):
  p = pl.program_id(1)          # 0 = accumulate context, 1 = produce output
  t = pl.program_id(2)          # sequence tile index
  hd = heads * dim_head

  # ------------- pass 0: accumulate the (HD,HD) context across N tiles ------
  @pl.when(p == 0)
  def _pass0():
    @pl.when(t == 0)
    def _init():
      ctx_acc[...] = jnp.zeros_like(ctx_acc)
      m_scr[...] = jnp.full_like(m_scr, -1e30)
      l_scr[...] = jnp.zeros_like(l_scr)

    x = x_ref[0]                                                   # (C, TN) bf16
    cdt = x.dtype
    k = jnp.dot(wk_ref[...], x, preferred_element_type=jnp.float32)  # (HD, TN)
    v = jnp.dot(wv_ref[...], x, preferred_element_type=jnp.float32)  # (HD, TN)
    lmask = lmask_ref[...]                                         # (1, TN) {0,1}

    # k.softmax(dim=-1) done online across tiles (rows of k are independent).
    m_old = m_scr[...]                                             # (HD, 1)
    m_new = jnp.maximum(m_old, jnp.max(k, axis=1, keepdims=True))
    alpha = jnp.exp(m_old - m_new)                                 # (HD, 1)
    pk = jnp.exp(k - m_new) * lmask          # padded lanes -> exact zeros
    l_scr[...] = alpha * l_scr[...] + jnp.sum(pk, axis=1, keepdims=True)
    # ctx[d, e] += sum_n pk[d, n] * v[e, n]   (contract in place, no .T)
    ctx_acc[...] = alpha * ctx_acc[...] + lax.dot_general(
        pk.astype(cdt), v.astype(cdt), (((1,), (1,)), ((), ())),
        preferred_element_type=jnp.float32)
    m_scr[...] = m_new

  # ------------- pass 1: fold Wout into ctx, stream output tiles ------------
  @pl.when(p == 1)
  def _pass1():
    x = x_ref[0]                                                   # (C, TN) bf16
    cdt = x.dtype

    @pl.when(t == 0)
    def _fold():
      # Exact k-softmax normalization (feeds two downstream matmuls).
      ctx = ctx_acc[...] * (1.0 / l_scr[...])                      # (HD, HD) f32
      ctx = ctx * bdmask_ref[...]                                  # block-diagonal
      # W_eff[c, d] = sum_e Wout[c, e] * ctx[d, e]   -> (C, HD)
      weff_scr[...] = lax.dot_general(
          wout_ref[...], ctx.astype(cdt), (((1,), (1,)), ((), ())),
          preferred_element_type=jnp.float32).astype(weff_scr.dtype)

    q = jnp.dot(wq_ref[...], x, preferred_element_type=jnp.float32)  # (HD, TN)
    # q.softmax(dim=-2): over the head-feature axis within each head (tile-local).
    qh = q.reshape(heads, dim_head, q.shape[-1])
    qh = jnp.exp(qh - jnp.max(qh, axis=1, keepdims=True))
    qh = qh * (pl.reciprocal(jnp.sum(qh, axis=1, keepdims=True), approx=True)
               * scale)
    qc = qh.reshape(hd, q.shape[-1]).astype(cdt)

    # to_out[0]: y = W_eff @ q + b     (C, TN), f32 accumulation.
    y = jnp.dot(weff_scr[...], qc,
                preferred_element_type=jnp.float32) + bout_ref[...]

    # to_out[1]: RMSNorm over channels == F.normalize(y, dim=C) * g * sqrt(C).
    sumsq = jnp.sum(y * y, axis=0, keepdims=True)                  # (1, TN) f32
    inv = lax.rsqrt(jnp.maximum(sumsq, eps * eps))                 # EUP
    o_ref[0] = (y * inv * gain_ref[...]).astype(o_ref.dtype)


def linear_attention(x, wqkv, wout, bout, g, *, heads, dim_head,
                     seq_tile=512, compute_dtype=jnp.bfloat16):
  b, c, n = x.shape
  hd = heads * dim_head
  scale = dim_head ** (-0.5)

  # Sequence tiling: lane-dense tiles of `tn` columns; pad N with zeros to a
  # multiple of tn (padded columns masked in-kernel, sliced off afterwards).
  tn = min(max(128, seq_tile), ((n + 127) // 128) * 128)
  tn = ((tn + 127) // 128) * 128
  n_pad = ((n + tn - 1) // tn) * tn
  nt = n_pad // tn

  x_c = x.astype(compute_dtype)
  if n_pad != n:
    x_c = jnp.pad(x_c, ((0, 0), (0, 0), (0, n_pad - n)))

  # Split / pre-cast weights (kernel_size=1 Conv1d == (out_ch, in_ch) matmul).
  wq = wqkv[:hd].astype(compute_dtype)
  wk = wqkv[hd:2 * hd].astype(compute_dtype)
  wv = wqkv[2 * hd:].astype(compute_dtype)
  wout_c = wout.astype(compute_dtype)
  bout2 = bout.reshape(c, 1).astype(jnp.float32)
  gain2 = (g * (c ** 0.5)).reshape(c, 1).astype(jnp.float32)   # g*sqrt(C) pre-folded

  # Precomputed resident masks (no per-step iota / compare / select).
  hidx = jnp.arange(hd, dtype=jnp.int32) // dim_head
  bdmask = (hidx[:, None] == hidx[None, :]).astype(jnp.float32)        # (HD, HD)
  lmask = (jnp.arange(n_pad, dtype=jnp.int32) < n
           ).astype(jnp.float32).reshape(1, n_pad)                     # (1, N_pad)

  kernel = functools.partial(
      _linear_attention_kernel,
      heads=heads, dim_head=dim_head, scale=scale, eps=1e-12)

  # VMEM budget from the actual footprint (+2x margin / headroom), clamped to
  # stay inside v7x's 64 MiB physical VMEM.
  def _isz(dt):
    return jnp.dtype(dt).itemsize
  blk = 2 * c * tn * _isz(compute_dtype) + 2 * c * tn * _isz(x.dtype)   # in+out dbl-buf
  resident = ((3 * hd * c + c * hd) * _isz(compute_dtype)
              + 2 * c * 4 + hd * hd * 4 + 2 * tn * 4)
  scratch = hd * hd * 4 + 2 * hd * 4 + c * hd * _isz(compute_dtype)
  live = 6 * hd * tn * 4                                                # k/v/pk/q temps
  mib = 1024 * 1024
  vmem_bytes = int(min(56 * mib, max(32 * mib, 2 * (blk + resident + scratch + live))))

  y = pl.pallas_call(
      kernel,
      out_shape=jax.ShapeDtypeStruct((b, c, n_pad), x.dtype),
      grid_spec=pltpu.PrefetchScalarGridSpec(
          num_scalar_prefetch=0,
          grid=(b, 2, nt),
          in_specs=[
              pl.BlockSpec((1, c, tn), lambda bi, p, t: (bi, 0, t)),    # x tile
              pl.BlockSpec((hd, c), lambda bi, p, t: (0, 0)),           # Wq (resident)
              pl.BlockSpec((hd, c), lambda bi, p, t: (0, 0)),           # Wk (resident)
              pl.BlockSpec((hd, c), lambda bi, p, t: (0, 0)),           # Wv (resident)
              pl.BlockSpec((c, hd), lambda bi, p, t: (0, 0)),           # Wout (resident)
              pl.BlockSpec((c, 1), lambda bi, p, t: (0, 0)),            # bias
              pl.BlockSpec((c, 1), lambda bi, p, t: (0, 0)),            # g*sqrt(C)
              pl.BlockSpec((hd, hd), lambda bi, p, t: (0, 0)),          # block-diag mask
              pl.BlockSpec((1, tn), lambda bi, p, t: (0, t)),           # lane mask tile
          ],
          # During pass 0 the output block index is pinned to tile 0 (stays
          # resident, no garbage writebacks); pass 1 streams tiles 0..nt-1.
          out_specs=pl.BlockSpec((1, c, tn), lambda bi, p, t: (bi, 0, p * t)),
          scratch_shapes=[
              pltpu.VMEM((hd, hd), jnp.float32),    # context accumulator
              pltpu.VMEM((hd, 1), jnp.float32),     # running row max (k)
              pltpu.VMEM((hd, 1), jnp.float32),     # running denom (k)
              pltpu.VMEM((c, hd), compute_dtype),   # W_eff = Wout . ctx^T
          ]),
      compiler_params=pltpu.CompilerParams(
          dimension_semantics=("parallel", "arbitrary", "arbitrary"),
          vmem_limit_bytes=vmem_bytes),
  )(x_c, wq, wk, wv, wout_c, bout2, gain2, bdmask, lmask)

  if n_pad != n:
    y = y[:, :, :n]
  return y


def _reference(x, wqkv, wout, bout, g, heads, dim_head):
  """Pure-JAX f32 reference mirroring the PyTorch forward."""
  b, c, n = x.shape
  hd = heads * dim_head
  qkv = jnp.einsum('oc,bcn->bon', wqkv, x)
  q, k, v = jnp.split(qkv, 3, axis=1)
  q, k, v = (t.reshape(b, heads, dim_head, n) for t in (q, k, v))
  q = jax.nn.softmax(q, axis=-2) * (dim_head ** -0.5)
  k = jax.nn.softmax(k, axis=-1)
  context = jnp.einsum('bhdn,bhen->bhde', k, v)
  out = jnp.einsum('bhde,bhdn->bhen', context, q)
  out = out.reshape(b, hd, n)
  y = jnp.einsum('oc,bcn->bon', wout, out) + bout[None, :, None]
  norm = jnp.sqrt(jnp.sum(y * y, axis=1, keepdims=True))
  return y / jnp.maximum(norm, 1e-12) * (c ** 0.5) * g[None, :, None]


if __name__ == "__main__":
  B, DIM, N = 2, 8, 200          # batch, channels (dim), sequence length
  HEADS, DIM_HEAD = 4, 32        # PyTorch module defaults -> hidden = 128
  HIDDEN = HEADS * DIM_HEAD

  key = jax.random.PRNGKey(0)
  kx, k1, k2, k3 = jax.random.split(key, 4)

  x = jax.random.normal(kx, (B, DIM, N), dtype=jnp.float32)
  # Conv1d weights (kernel_size=1) == plain (out_ch, in_ch) matrices.
  wqkv = jax.random.normal(k1, (3 * HIDDEN, DIM), dtype=jnp.float32) * (DIM ** -0.5)
  wout = jax.random.normal(k2, (DIM, HIDDEN), dtype=jnp.float32) * (HIDDEN ** -0.5)
  bout = jax.random.normal(k3, (DIM,), dtype=jnp.float32) * 0.1
  g = jnp.ones((DIM,), dtype=jnp.float32)   # RMSNorm gain

  # seq_tile=128 exercises the multi-tile online-softmax/context-accumulation
  # path at this small N (200 -> 2 tiles); production sizes would use 512-1024.
  y = linear_attention(x, wqkv, wout, bout, g, heads=HEADS, dim_head=DIM_HEAD,
                       seq_tile=128)
  y = jax.block_until_ready(y)

  y_ref = _reference(x, wqkv, wout, bout, g, HEADS, DIM_HEAD)
  assert y.shape == (B, DIM, N)
  # bf16 MXU operands (f32 accumulation) -> tolerance loosened vs f32 ref.
  assert jnp.allclose(y, y_ref, atol=5e-2, rtol=5e-2), "mismatch vs reference"

  print("KERNEL_OK")
</pallas_src>

<mosaic_0001>
module attributes {stable_mosaic.version = 11 : i64} {
  func.func @_linear_attention_kernel(%arg0: i32, %arg1: i32, %arg2: i32, %arg3: memref<1x8x128xbf16, #tpu.memory_space<vmem>>, %arg4: memref<128x8xbf16, #tpu.memory_space<vmem>>, %arg5: memref<128x8xbf16, #tpu.memory_space<vmem>>, %arg6: memref<128x8xbf16, #tpu.memory_space<vmem>>, %arg7: memref<8x128xbf16, #tpu.memory_space<vmem>>, %arg8: memref<8x1xf32, #tpu.memory_space<vmem>>, %arg9: memref<8x1xf32, #tpu.memory_space<vmem>>, %arg10: memref<128x128xf32, #tpu.memory_space<vmem>>, %arg11: memref<1x128xf32, #tpu.memory_space<vmem>>, %arg12: memref<1x8x128xf32, #tpu.memory_space<vmem>>, %arg13: memref<128x128xf32, #tpu.memory_space<vmem>>, %arg14: memref<128x1xf32, #tpu.memory_space<vmem>>, %arg15: memref<128x1xf32, #tpu.memory_space<vmem>>, %arg16: memref<8x128xbf16, #tpu.memory_space<vmem>>) attributes {dimension_semantics = [#tpu.dimension_semantics<parallel>, #tpu.dimension_semantics<arbitrary>, #tpu.dimension_semantics<arbitrary>], iteration_bounds = array<i64: 2, 2, 2>, scalar_prefetch = 0 : i64, scratch_operands = 4 : i64, tpu.core_type = #tpu.core_type<tc>, window_params = [{transform_indices = @transform_0, window_bounds = array<i64: 1, 8, 128>}, {pipeline_mode = #tpu.pipeline_mode<synchronous>, transform_indices = @transform_1, window_bounds = array<i64: 128, 8>}, {pipeline_mode = #tpu.pipeline_mode<synchronous>, transform_indices = @transform_2, window_bounds = array<i64: 128, 8>}, {pipeline_mode = #tpu.pipeline_mode<synchronous>, transform_indices = @transform_3, window_bounds = array<i64: 128, 8>}, {pipeline_mode = #tpu.pipeline_mode<synchronous>, transform_indices = @transform_4, window_bounds = array<i64: 8, 128>}, {pipeline_mode = #tpu.pipeline_mode<synchronous>, transform_indices = @transform_5, window_bounds = array<i64: 8, 1>}, {pipeline_mode = #tpu.pipeline_mode<synchronous>, transform_indices = @transform_6, window_bounds = array<i64: 8, 1>}, {pipeline_mode = #tpu.pipeline_mode<synchronous>, transform_indices = @transform_7, window_bounds = array<i64: 128, 128>}, {transform_indices = @transform_8, window_bounds = array<i64: 1, 128>}, {transform_indices = @transform_9, window_bounds = array<i64: 1, 8, 128>}]} {
    %c0_i32 = arith.constant 0 : i32
    %0 = arith.cmpi eq, %arg1, %c0_i32 : i32
    %1 = arith.extui %0 : i1 to i32
    %c0_i32_0 = arith.constant 0 : i32
    %2 = arith.cmpi ne, %1, %c0_i32_0 : i32
    scf.if %2 {
      %c0_i32_2 = arith.constant 0 : i32
      %6 = arith.cmpi eq, %arg2, %c0_i32_2 : i32
      %7 = arith.extui %6 : i1 to i32
      %c0_i32_3 = arith.constant 0 : i32
      %8 = arith.cmpi ne, %7, %c0_i32_3 : i32
      scf.if %8 {
        %cst_28 = arith.constant 0.000000e+00 : f32
        %42 = vector.broadcast %cst_28 : f32 to vector<128x128xf32>
        %c0_29 = arith.constant 0 : index
        %c0_30 = arith.constant 0 : index
        %43 = vector.load %arg13[%c0_29, %c0_30] : memref<128x128xf32, #tpu.memory_space<vmem>>, vector<128x128xf32>
        tpu.vector_store %arg13[%c0_29, %c0_30], %42 {strides = array<i32>} : memref<128x128xf32, #tpu.memory_space<vmem>>, vector<128x128xf32>,
        %cst_31 = arith.constant -1.000000e+30 : f32
        %44 = vector.broadcast %cst_31 : f32 to vector<128x1xf32>
        %c0_32 = arith.constant 0 : index
        %c0_33 = arith.constant 0 : index
        %45 = vector.load %arg14[%c0_32, %c0_33] : memref<128x1xf32, #tpu.memory_space<vmem>>, vector<128x1xf32>
        tpu.vector_store %arg14[%c0_32, %c0_33], %44 {strides = array<i32>} : memref<128x1xf32, #tpu.memory_space<vmem>>, vector<128x1xf32>,
        %cst_34 = arith.constant 0.000000e+00 : f32
        %46 = vector.broadcast %cst_34 : f32 to vector<128x1xf32>
        %c0_35 = arith.constant 0 : index
        %c0_36 = arith.constant 0 : index
        %47 = vector.load %arg15[%c0_35, %c0_36] : memref<128x1xf32, #tpu.memory_space<vmem>>, vector<128x1xf32>
        tpu.vector_store %arg15[%c0_35, %c0_36], %46 {strides = array<i32>} : memref<128x1xf32, #tpu.memory_space<vmem>>, vector<128x1xf32>,
      } else {
      }
      %c0 = arith.constant 0 : index
      %c0_4 = arith.constant 0 : index
      %c0_5 = arith.constant 0 : index
      %9 = vector.load %arg3[%c0, %c0_4, %c0_5] : memref<1x8x128xbf16, #tpu.memory_space<vmem>>, vector<1x8x128xbf16>
      %10 = vector.shape_cast %9 : vector<1x8x128xbf16> to vector<8x128xbf16>
      %c0_6 = arith.constant 0 : index
      %c0_7 = arith.constant 0 : index
      %11 = vector.load %arg5[%c0_6, %c0_7] : memref<128x8xbf16, #tpu.memory_space<vmem>>, vector<128x8xbf16>
      %cst = arith.constant dense<0.000000e+00> : vector<128x128xf32>
      %12 = tpu.matmul %11, %10, %cst {dimension_numbers = #tpu.dot_dimension_numbers<[1], [0], [0], [1], [0, 0, 1, 1], [], []>} : vector<128x8xbf16>, vector<8x128xbf16>, vector<128x128xf32> -> vector<128x128xf32>
      %c0_8 = arith.constant 0 : index
      %c0_9 = arith.constant 0 : index
      %13 = vector.load %arg6[%c0_8, %c0_9] : memref<128x8xbf16, #tpu.memory_space<vmem>>, vector<128x8xbf16>
      %cst_10 = arith.constant dense<0.000000e+00> : vector<128x128xf32>
      %14 = tpu.matmul %13, %10, %cst_10 {dimension_numbers = #tpu.dot_dimension_numbers<[1], [0], [0], [1], [0, 0, 1, 1], [], []>} : vector<128x8xbf16>, vector<8x128xbf16>, vector<128x128xf32> -> vector<128x128xf32>
      %c0_11 = arith.constant 0 : index
      %c0_12 = arith.constant 0 : index
      %15 = vector.load %arg11[%c0_11, %c0_12] : memref<1x128xf32, #tpu.memory_space<vmem>>, vector<1x128xf32>
      %c0_13 = arith.constant 0 : index
      %c0_14 = arith.constant 0 : index
      %16 = vector.load %arg14[%c0_13, %c0_14] : memref<128x1xf32, #tpu.memory_space<vmem>>, vector<128x1xf32>
      %cst_15 = arith.constant dense<0xFF800000> : vector<128xf32>
      %17 = vector.multi_reduction <maximumf>, %12, %cst_15 [1] : vector<128x128xf32> to vector<128xf32>
      %18 = vector.shape_cast %17 : vector<128xf32> to vector<128x1xf32>
      %19 = arith.maximumf %16, %18 : vector<128x1xf32>
      %20 = arith.subf %16, %19 : vector<128x1xf32>
      %21 = math.exp %20 : vector<128x1xf32>
      %22 = vector.broadcast %19 : vector<128x1xf32> to vector<128x128xf32>
      %23 = arith.subf %12, %22 : vector<128x128xf32>
      %24 = math.exp %23 : vector<128x128xf32>
      %25 = vector.broadcast %15 : vector<1x128xf32> to vector<128x128xf32>
      %26 = arith.mulf %24, %25 : vector<128x128xf32>
      %c0_16 = arith.constant 0 : index
      %c0_17 = arith.constant 0 : index
      %27 = vector.load %arg15[%c0_16, %c0_17] : memref<128x1xf32, #tpu.memory_space<vmem>>, vector<128x1xf32>
      %28 = arith.mulf %21, %27 : vector<128x1xf32>
      %cst_18 = arith.constant dense<0.000000e+00> : vector<128xf32>
      %29 = vector.multi_reduction <add>, %26, %cst_18 [1] : vector<128x128xf32> to vector<128xf32>
      %30 = vector.shape_cast %29 : vector<128xf32> to vector<128x1xf32>
      %31 = arith.addf %28, %30 : vector<128x1xf32>
      %c0_19 = arith.constant 0 : index
      %c0_20 = arith.constant 0 : index
      %32 = vector.load %arg15[%c0_19, %c0_20] : memref<128x1xf32, #tpu.memory_space<vmem>>, vector<128x1xf32>
      tpu.vector_store %arg15[%c0_19, %c0_20], %31 {strides = array<i32>} : memref<128x1xf32, #tpu.memory_space<vmem>>, vector<128x1xf32>,
      %c0_21 = arith.constant 0 : index
      %c0_22 = arith.constant 0 : index
      %33 = vector.load %arg13[%c0_21, %c0_22] : memref<128x128xf32, #tpu.memory_space<vmem>>, vector<128x128xf32>
      %34 = vector.broadcast %21 : vector<128x1xf32> to vector<128x128xf32>
      %35 = arith.mulf %34, %33 : vector<128x128xf32>
      %36 = arith.truncf %26 : vector<128x128xf32> to vector<128x128xbf16>
      %37 = arith.truncf %14 : vector<128x128xf32> to vector<128x128xbf16>
      %cst_23 = arith.constant dense<0.000000e+00> : vector<128x128xf32>
      %38 = tpu.matmul %36, %37, %cst_23 {dimension_numbers = #tpu.dot_dimension_numbers<[1], [1], [0], [0], [0, 0, 1, 0], [], []>} : vector<128x128xbf16>, vector<128x128xbf16>, vector<128x128xf32> -> vector<128x128xf32>
      %39 = arith.addf %35, %38 : vector<128x128xf32>
      %c0_24 = arith.constant 0 : index
      %c0_25 = arith.constant 0 : index
      %40 = vector.load %arg13[%c0_24, %c0_25] : memref<128x128xf32, #tpu.memory_space<vmem>>, vector<128x128xf32>
      tpu.vector_store %arg13[%c0_24, %c0_25], %39 {strides = array<i32>} : memref<128x128xf32, #tpu.memory_space<vmem>>, vector<128x128xf32>,
      %c0_26 = arith.constant 0 : index
      %c0_27 = arith.constant 0 : index
      %41 = vector.load %arg14[%c0_26, %c0_27] : memref<128x1xf32, #tpu.memory_space<vmem>>, vector<128x1xf32>
      tpu.vector_store %arg14[%c0_26, %c0_27], %19 {strides = array<i32>} : memref<128x1xf32, #tpu.memory_space<vmem>>, vector<128x1xf32>,
    } else {
    }
    %c1_i32 = arith.constant 1 : i32
    %3 = arith.cmpi eq, %arg1, %c1_i32 : i32
    %4 = arith.extui %3 : i1 to i32
    %c0_i32_1 = arith.constant 0 : i32
    %5 = arith.cmpi ne, %4, %c0_i32_1 : i32
    scf.if %5 {
      %c0 = arith.constant 0 : index
      %c0_2 = arith.constant 0 : index
      %c0_3 = arith.constant 0 : index
      %6 = vector.load %arg3[%c0, %c0_2, %c0_3] : memref<1x8x128xbf16, #tpu.memory_space<vmem>>, vector<1x8x128xbf16>
      %7 = vector.shape_cast %6 : vector<1x8x128xbf16> to vector<8x128xbf16>
      %c0_i32_4 = arith.constant 0 : i32
      %8 = arith.cmpi eq, %arg2, %c0_i32_4 : i32
      %9 = arith.extui %8 : i1 to i32
      %c0_i32_5 = arith.constant 0 : i32
      %10 = arith.cmpi ne, %9, %c0_i32_5 : i32
      scf.if %10 {
        %c0_23 = arith.constant 0 : index
        %c0_24 = arith.constant 0 : index
        %47 = vector.load %arg13[%c0_23, %c0_24] : memref<128x128xf32, #tpu.memory_space<vmem>>, vector<128x128xf32>
        %c0_25 = arith.constant 0 : index
        %c0_26 = arith.constant 0 : index
        %48 = vector.load %arg15[%c0_25, %c0_26] : memref<128x1xf32, #tpu.memory_space<vmem>>, vector<128x1xf32>
        %cst_27 = arith.constant 1.000000e+00 : f32
        %49 = vector.broadcast %cst_27 : f32 to vector<128x1xf32>
        %50 = arith.divf %49, %48 : vector<128x1xf32>
        %51 = vector.broadcast %50 : vector<128x1xf32> to vector<128x128xf32>
        %52 = arith.mulf %47, %51 : vector<128x128xf32>
        %c0_28 = arith.constant 0 : index
        %c0_29 = arith.constant 0 : index
        %53 = vector.load %arg10[%c0_28, %c0_29] : memref<128x128xf32, #tpu.memory_space<vmem>>, vector<128x128xf32>
        %54 = arith.mulf %52, %53 : vector<128x128xf32>
        %c0_30 = arith.constant 0 : index
        %c0_31 = arith.constant 0 : index
        %55 = vector.load %arg7[%c0_30, %c0_31] : memref<8x128xbf16, #tpu.memory_space<vmem>>, vector<8x128xbf16>
        %56 = arith.truncf %54 : vector<128x128xf32> to vector<128x128xbf16>
        %cst_32 = arith.constant dense<0.000000e+00> : vector<8x128xf32>
        %57 = tpu.matmul %55, %56, %cst_32 {dimension_numbers = #tpu.dot_dimension_numbers<[1], [1], [0], [0], [0, 0, 1, 0], [], []>} : vector<8x128xbf16>, vector<128x128xbf16>, vector<8x128xf32> -> vector<8x128xf32>
        %58 = arith.truncf %57 : vector<8x128xf32> to vector<8x128xbf16>
        %c0_33 = arith.constant 0 : index
        %c0_34 = arith.constant 0 : index
        %59 = vector.load %arg16[%c0_33, %c0_34] : memref<8x128xbf16, #tpu.memory_space<vmem>>, vector<8x128xbf16>
        tpu.vector_store %arg16[%c0_33, %c0_34], %58 {strides = array<i32>} : memref<8x128xbf16, #tpu.memory_space<vmem>>, vector<8x128xbf16>,
      } else {
      }
      %c0_6 = arith.constant 0 : index
      %c0_7 = arith.constant 0 : index
      %11 = vector.load %arg4[%c0_6, %c0_7] : memref<128x8xbf16, #tpu.memory_space<vmem>>, vector<128x8xbf16>
      %cst = arith.constant dense<0.000000e+00> : vector<128x128xf32>
      %12 = tpu.matmul %11, %7, %cst {dimension_numbers = #tpu.dot_dimension_numbers<[1], [0], [0], [1], [0, 0, 1, 1], [], []>} : vector<128x8xbf16>, vector<8x128xbf16>, vector<128x128xf32> -> vector<128x128xf32>
      %13 = vector.shape_cast %12 : vector<128x128xf32> to vector<4x32x128xf32>
      %cst_8 = arith.constant dense<0xFF800000> : vector<4x128xf32>
      %14 = vector.multi_reduction <maximumf>, %13, %cst_8 [1] : vector<4x32x128xf32> to vector<4x128xf32>
      %15 = vector.shape_cast %14 : vector<4x128xf32> to vector<4x1x128xf32>
      %16 = vector.broadcast %15 : vector<4x1x128xf32> to vector<4x32x128xf32>
      %17 = arith.subf %13, %16 : vector<4x32x128xf32>
      %18 = math.exp %17 : vector<4x32x128xf32>
      %cst_9 = arith.constant dense<0.000000e+00> : vector<4x128xf32>
      %19 = vector.multi_reduction <add>, %18, %cst_9 [1] : vector<4x32x128xf32> to vector<4x128xf32>
      %20 = vector.shape_cast %19 : vector<4x128xf32> to vector<4x1x128xf32>
      %21 = tpu.reciprocal %20 {approx = true} : vector<4x1x128xf32> -> vector<4x1x128xf32>
      %cst_10 = arith.constant 0.176776692 : f32
      %22 = vector.broadcast %cst_10 : f32 to vector<4x1x128xf32>
      %23 = arith.mulf %21, %22 : vector<4x1x128xf32>
      %24 = vector.broadcast %23 : vector<4x1x128xf32> to vector<4x32x128xf32>
      %25 = arith.mulf %18, %24 : vector<4x32x128xf32>
      %26 = vector.shape_cast %25 : vector<4x32x128xf32> to vector<128x128xf32>
      %27 = arith.truncf %26 : vector<128x128xf32> to vector<128x128xbf16>
      %c0_11 = arith.constant 0 : index
      %c0_12 = arith.constant 0 : index
      %28 = vector.load %arg16[%c0_11, %c0_12] : memref<8x128xbf16, #tpu.memory_space<vmem>>, vector<8x128xbf16>
      %cst_13 = arith.constant dense<0.000000e+00> : vector<8x128xf32>
      %29 = tpu.matmul %28, %27, %cst_13 {dimension_numbers = #tpu.dot_dimension_numbers<[1], [0], [0], [1], [0, 0, 1, 1], [], []>} : vector<8x128xbf16>, vector<128x128xbf16>, vector<8x128xf32> -> vector<8x128xf32>
      %c0_14 = arith.constant 0 : index
      %c0_15 = arith.constant 0 : index
      %30 = vector.load %arg8[%c0_14, %c0_15] : memref<8x1xf32, #tpu.memory_space<vmem>>, vector<8x1xf32>
      %31 = vector.broadcast %30 : vector<8x1xf32> to vector<8x128xf32>
      %32 = arith.addf %29, %31 : vector<8x128xf32>
      %33 = arith.mulf %32, %32 : vector<8x128xf32>
      %cst_16 = arith.constant dense<0.000000e+00> : vector<128xf32>
      %34 = vector.multi_reduction <add>, %33, %cst_16 [0] : vector<8x128xf32> to vector<128xf32>
      %35 = vector.shape_cast %34 : vector<128xf32> to vector<1x128xf32>
      %cst_17 = arith.constant 1.000000e-24 : f32
      %36 = vector.broadcast %cst_17 : f32 to vector<1x128xf32>
      %37 = arith.maximumf %35, %36 : vector<1x128xf32>
      %38 = math.rsqrt %37 : vector<1x128xf32>
      %39 = vector.broadcast %38 : vector<1x128xf32> to vector<8x128xf32>
      %40 = arith.mulf %32, %39 : vector<8x128xf32>
      %c0_18 = arith.constant 0 : index
      %c0_19 = arith.constant 0 : index
      %41 = vector.load %arg9[%c0_18, %c0_19] : memref<8x1xf32, #tpu.memory_space<vmem>>, vector<8x1xf32>
      %42 = vector.broadcast %41 : vector<8x1xf32> to vector<8x128xf32>
      %43 = arith.mulf %40, %42 : vector<8x128xf32>
      %c0_20 = arith.constant 0 : index
      %c0_21 = arith.constant 0 : index
      %c0_22 = arith.constant 0 : index
      %44 = vector.load %arg12[%c0_20, %c0_21, %c0_22] : memref<1x8x128xf32, #tpu.memory_space<vmem>>, vector<1x8x128xf32>
      %45 = vector.shape_cast %44 : vector<1x8x128xf32> to vector<8x128xf32>
      %46 = vector.shape_cast %43 : vector<8x128xf32> to vector<1x8x128xf32>
      tpu.vector_store %arg12[%c0_20, %c0_21, %c0_22], %46 {strides = array<i32>} : memref<1x8x128xf32, #tpu.memory_space<vmem>>, vector<1x8x128xf32>,
    } else {
    }
    return
  }
  func.func @transform_0(%arg0: i32, %arg1: i32, %arg2: i32) -> (i32, i32, i32) {
    %c0_i32 = arith.constant 0 : i32
    %c0_i32_0 = arith.constant 0 : i32
    return %arg0, %c0_i32, %arg2 : i32, i32, i32
  }
  func.func @transform_1(%arg0: i32, %arg1: i32, %arg2: i32) -> (i32, i32) {
    %c0_i32 = arith.constant 0 : i32
    %c0_i32_0 = arith.constant 0 : i32
    %c0_i32_1 = arith.constant 0 : i32
    return %c0_i32, %c0_i32_0 : i32, i32
  }
  func.func @transform_2(%arg0: i32, %arg1: i32, %arg2: i32) -> (i32, i32) {
    %c0_i32 = arith.constant 0 : i32
    %c0_i32_0 = arith.constant 0 : i32
    %c0_i32_1 = arith.constant 0 : i32
    return %c0_i32, %c0_i32_0 : i32, i32
  }
  func.func @transform_3(%arg0: i32, %arg1: i32, %arg2: i32) -> (i32, i32) {
    %c0_i32 = arith.constant 0 : i32
    %c0_i32_0 = arith.constant 0 : i32
    %c0_i32_1 = arith.constant 0 : i32
    return %c0_i32, %c0_i32_0 : i32, i32
  }
  func.func @transform_4(%arg0: i32, %arg1: i32, %arg2: i32) -> (i32, i32) {
    %c0_i32 = arith.constant 0 : i32
    %c0_i32_0 = arith.constant 0 : i32
    %c0_i32_1 = arith.constant 0 : i32
    return %c0_i32, %c0_i32_0 : i32, i32
  }
  func.func @transform_5(%arg0: i32, %arg1: i32, %arg2: i32) -> (i32, i32) {
    %c0_i32 = arith.constant 0 : i32
    %c0_i32_0 = arith.constant 0 : i32
    %c0_i32_1 = arith.constant 0 : i32
    return %c0_i32, %c0_i32_0 : i32, i32
  }
  func.func @transform_6(%arg0: i32, %arg1: i32, %arg2: i32) -> (i32, i32) {
    %c0_i32 = arith.constant 0 : i32
    %c0_i32_0 = arith.constant 0 : i32
    %c0_i32_1 = arith.constant 0 : i32
    return %c0_i32, %c0_i32_0 : i32, i32
  }
  func.func @transform_7(%arg0: i32, %arg1: i32, %arg2: i32) -> (i32, i32) {
    %c0_i32 = arith.constant 0 : i32
    %c0_i32_0 = arith.constant 0 : i32
    %c0_i32_1 = arith.constant 0 : i32
    return %c0_i32, %c0_i32_0 : i32, i32
  }
  func.func @transform_8(%arg0: i32, %arg1: i32, %arg2: i32) -> (i32, i32) {
    %c0_i32 = arith.constant 0 : i32
    %c0_i32_0 = arith.constant 0 : i32
    return %c0_i32, %arg2 : i32, i32
  }
  func.func @transform_9(%arg0: i32, %arg1: i32, %arg2: i32) -> (i32, i32, i32) {
    %0 = arith.muli %arg1, %arg2 : i32
    %c0_i32 = arith.constant 0 : i32
    %c0_i32_0 = arith.constant 0 : i32
    return %arg0, %c0_i32, %0 : i32, i32, i32
  }
}

</mosaic_0001>

<bundles_post_ra>
// kernel: tpu_custom_call.1
= control target key start
LH: loop header
LB: loop body
LE: loop exit
PB: predicated region body
PF: predicated region fallthrough
CT: control target
= control target key end

     0   :  { %s3678_s0 = inlined_call_operand.vmem [shape: bf16[2,8,256], index: 0, kind: input, shape index: {}]   ;;  %s3679_s1 = inlined_call_operand.vmem [shape: bf16[128,8], index: 1, kind: input, shape index: {}]   ;;  %s3680_s2 = inlined_call_operand.vmem [shape: bf16[128,8], index: 2, kind: input, shape index: {}]   ;;  %s3681_s3 = inlined_call_operand.vmem [shape: bf16[128,8], index: 3, kind: input, shape index: {}]   ;;  %s3682_s4 = inlined_call_operand.vmem [shape: bf16[8,128], index: 4, kind: input, shape index: {}]   ;;  %s3683_s5 = inlined_call_operand.vmem [shape: f32[8,1], index: 5, kind: input, shape index: {}]   ;;  %s3684_s6 = inlined_call_operand.vmem [shape: f32[8,1], index: 6, kind: input, shape index: {}]   ;;  %s3685_s7 = inlined_call_operand.vmem [shape: f32[128,128], index: 7, kind: input, shape index: {}]   ;;  %s3686_s8 = inlined_call_operand.vmem [shape: f32[1,256], index: 8, kind: input, shape index: {}]   ;;  %s3687_s9 = inlined_call_operand.hbm [shape: f32[2,8,256], index: 9, kind: output, shape index: {}]  }
   0x1   :  { %3696 = sst [smem:[#allocation17_spill]] %s3678_s0 }
   0x2   :  { %3697 = sst [smem:[#allocation18_spill]] %s3679_s1 }
   0x3   :  { %14 = vsyncpa [#allocation7], 0 }
   0x4   :  { %16 = vsyncpa [#allocation7 + $0x1], 0  ;;  %s2897_s30 = smov 0   ;;  %s2899_s10 = smov 0  }
   0x5   :  { %s2901_s11 = smov 0   ;;  %s2903_s12 = smov 0  }
   0x6   :  { %s2905_s13 = smov 0   ;;  %s2907_s14 = smov 0  }
   0x7   :  { %s2909_s15 = smov 0   ;;  %s2911_s16 = smov 0  }
   0x8   :  { %s2913_s17 = smov 0   ;;  %s2915_s18 = smov 0  }
   0x9 LB: > { %3698 = sst [smem:[#allocation9_spill]] %s2807_s11  ;;  %s2192_s19 = sadd.s32 4294967295, %s2835_s18   ;;  %s2835_s18 = sphi %s2915_s18, %s22_s18   ;;  %s2831_s17 = sphi %s2913_s17, %s3721_s17   ;;  %s2827_s16 = sphi %s2911_s16, %s3720_s16   ;;  %s2823_s15 = sphi %s2909_s15, %s3719_s15   ;;  %s2819_s14 = sphi %s2907_s14, %s3718_s14   ;;  %s2815_s13 = sphi %s2905_s13, %s3717_s13   ;;  %s2811_s12 = sphi %s2903_s12, %s3716_s12   ;;  %s2807_s11 = sphi %s2901_s11, %s3715_s11   ;;  %s2803_s10 = sphi %s2899_s10, %s3723_s10   ;;  %s2799_s30 = sphi %s2897_s30, %s3722_s30  }
   0xa   : > { %3699 = sst [smem:[#allocation10_spill]] %s2823_s15  ;;  %s2193_s20 = sadd.s32 4294967294, %s2835_s18  }
   0xb   : > { %3700 = sst [smem:[#allocation11_spill]] %s2827_s16  ;;  %s34_s21 = sadd.s32 1, %s2823_s15 }
   0xc   : > { %3701 = sst [smem:[#allocation12_spill]] %s2831_s17  ;;  %p35_p0 = scmp.ge.s32.totalorder %s34_s21, 2 }
   0xd   : > { %s37_s22 = sadd.s32 1, %s2827_s16  ;;  %s41_s23 = sadd.s32 1, %s2831_s17 }
   0xe   : > { %s246_s24 = smul.u32 %s2823_s15, %s2827_s16  ;;  %s3725_s21 = smov (%p35_p0, %s34_s21), 0 }
   0xf   : > { %3702 = sst [smem:[#allocation13_spill]] %s3725_s21  ;;  %s3727_s22 = smov (!%p35_p0, %s37_s22), %s2827_s16 }
  0x10   : > { %p263_p1 = scmp.ne.s32.totalorder %s2807_s11, %s2803_s10  ;;  %p264_p2 = scmp.eq.s32.totalorder %s2192_s19, 7 }
  0x11   : > { %p39_p3 = scmp.ge.s32.totalorder %s3727_s22, 2  ;;  %p269_p4 = scmp.ne.s32.totalorder %s2803_s10, %s2799_s30 }
  0x12   : > { %p2961_p5 = por %p264_p2, %p263_p1  ;;  %p270_p6 = scmp.eq.s32.totalorder %s2193_s20, 7 }
  0x13   : > { %s3729_s22 = smov (%p39_p3, %s3727_s22), 0  ;;  %s3731_s23 = smov (!%p39_p3, %s41_s23), %s2831_s17 }
  0x14   : > { %3704 = sst [smem:[#allocation14_spill]] %s3729_s22  ;;  %s247_s26 = smul.u32 %s3729_s22, %s3725_s21 }
  0x15   : > { %p2970_p7 = por %p270_p6, %p269_p4  ;;  %p43_p8 = scmp.ge.s32.totalorder %s3731_s23, 2 }
  0x16   : > { %p2196_p9 = scmp.ge.s32.totalorder %s2835_s18, 1  ;;  %s249_s28 = ssub.s32 %s246_s24, %s247_s26 }
  0x17   : > { %p326_p10 = scmp.lt.s32.totalorder %s2835_s18, 9  ;;  %s3733_s23 = smov (%p43_p8, %s3731_s23), 0 }
  0x18   : > { %3706 = sst [smem:[#allocation15_spill]] %s3733_s23  ;;  %s248_s29 = ssub.s32 %s2831_s17, %s3733_s23 }
  0x19   : > { %p327_p11 = pnand %p2196_p9, %p326_p10  ;;  %s250_s19 = sor.u32 %s249_s28, %s248_s29 }
  0x1a   : > { %s253_s20 = sadd.s32 1, %s2807_s11  ;;  %p251_p12 = scmp.eq.s32.totalorder %s250_s19, 0 }
  0x1b   : > { %330 = sbr.rel (%p327_p11) target bundleno = 1815 (0x717), region = 56  ;;  %s3695_s22 = sand.u32 (!%p327_p11), 1, %s2803_s10  }
  0x1c   : > { %s2982_s16 = scalar_select %p251_p12, %s2807_s11, %s253_s20  }
  0x1d   : > { %p368_p13 = scmp.lt.s32.totalorder (!%p327_p11), %s2819_s14, 1  ;;  %s2988_s24 = sshll.u32 (!%p327_p11), %s3695_s22, 3 }
  0x1e   : > { %3707 = sst [smem:[#allocation16_spill]] %s2982_s16  ;;  %p370_p0 = scmp.lt.s32.totalorder (!%p327_p11), %s2811_s12, 1 }
  0x1f   : > { %s3708_s0 = sld [smem:[#allocation17_spill]] (!%p327_p11)  ;;  %p2200_p1 = scmp.ne.s32.totalorder (!%p327_p11), %s2815_s13, 0 }
  0x20   : > { %s369_s26 = scalar_select %p368_p13, %s2819_s14, 1 }
  0x21   : > { %s2993_s28 = scalar_select %p370_p0, %s2811_s12, 1 }
  0x22   : > { %s2198_s29 = sshll.u32 %s369_s26, 1  ;;  %384 = sbr.rel (%p2200_p1) target bundleno = 799 (0x31f), region = 60 }
  0x23   : > { %s373_s19 = sadd.s32 %s2198_s29, %s2993_s28  ;;  %p2201_p2 = scmp.ne.s32.totalorder (!%p2200_p1), %s2811_s12, 0 }
  0x24   : > { %s2199_s17 = sshll.u32 %s373_s19, 2 }
  0x25   : > { %s3003_s11 = scalar_lea.vmem %s3708_s0, %s2199_s17 }
  0x27   : > { %388 = sbr.rel (%p2201_p2) target bundleno = 69 (0x45), region = 64 }
  0x2c   : > { %vm405_vm0 = vcmask 7168   ;;  %v2837_v0 = vmov 0.0   ;;  %v2838_v1 = vmov -1e+30  }
  0x2d   : > { %389 = vst [vmem:[#allocation2 + $0x30] sm:$0xff] %v2837_v0  ;;  %390 = vst [vmem:[#allocation2] sm:$0xff] %v2837_v0 }
  0x2e   : > { %391 = vst [vmem:[#allocation2 + $0x58] sm:$0xff] %v2837_v0  ;;  %392 = vst [vmem:[#allocation2 + $0x18] sm:$0xff] %v2837_v0 }
  0x2f   : > { %393 = vst [vmem:[#allocation2 + $0x50] sm:$0xff] %v2837_v0  ;;  %394 = vst [vmem:[#allocation2 + $0x68] sm:$0xff] %v2837_v0 }
  0x30   : > { %395 = vst [vmem:[#allocation2 + $0x8] sm:$0xff] %v2837_v0  ;;  %396 = vst [vmem:[#allocation2 + $0x48] sm:$0xff] %v2837_v0 }
  0x31   : > { %397 = vst [vmem:[#allocation2 + $0x40] sm:$0xff] %v2837_v0  ;;  %398 = vst [vmem:[#allocation2 + $0x20] sm:$0xff] %v2837_v0 }
  0x32   : > { %399 = vst [vmem:[#allocation2 + $0x10] sm:$0xff] %v2837_v0  ;;  %400 = vst [vmem:[#allocation2 + $0x38] sm:$0xff] %v2837_v0 }
  0x33   : > { %401 = vst [vmem:[#allocation2 + $0x60] sm:$0xff] %v2837_v0  ;;  %402 = vst [vmem:[#allocation2 + $0x70] sm:$0xff] %v2837_v0 }
  0x34   : > { %403 = vst [vmem:[#allocation2 + $0x78] sm:$0xff] %v2837_v0  ;;  %404 = vst [vmem:[#allocation2 + $0x28] sm:$0xff] %v2837_v0 }
  0x35   : > { %406 = vst.msk [vmem:[#allocation3] sm:$0xff] %vm405_vm0, %v2838_v1  ;;  %407 = vst.msk [vmem:[#allocation3 + $0x8] sm:$0xff] %vm405_vm0, %v2838_v1 }
  0x36   : > { %408 = vst.msk [vmem:[#allocation3 + $0x10] sm:$0xff] %vm405_vm0, %v2838_v1  ;;  %409 = vst.msk [vmem:[#allocation3 + $0x18] sm:$0xff] %vm405_vm0, %v2838_v1 }
  0x37   : > { %410 = vst.msk [vmem:[#allocation3 + $0x20] sm:$0xff] %vm405_vm0, %v2838_v1  ;;  %411 = vst.msk [vmem:[#allocation3 + $0x28] sm:$0xff] %vm405_vm0, %v2838_v1 }
  0x38   : > { %412 = vst.msk [vmem:[#allocation3 + $0x30] sm:$0xff] %vm405_vm0, %v2838_v1  ;;  %413 = vst.msk [vmem:[#allocation3 + $0x38] sm:$0xff] %vm405_vm0, %v2838_v1 }
  0x39   : > { %414 = vst.msk [vmem:[#allocation3 + $0x40] sm:$0xff] %vm405_vm0, %v2838_v1  ;;  %415 = vst.msk [vmem:[#allocation3 + $0x48] sm:$0xff] %vm405_vm0, %v2838_v1 }
  0x3a   : > { %416 = vst.msk [vmem:[#allocation3 + $0x50] sm:$0xff] %vm405_vm0, %v2838_v1  ;;  %417 = vst.msk [vmem:[#allocation3 + $0x58] sm:$0xff] %vm405_vm0, %v2838_v1 }
  0x3b   : > { %418 = vst.msk [vmem:[#allocation3 + $0x60] sm:$0xff] %vm405_vm0, %v2838_v1  ;;  %419 = vst.msk [vmem:[#allocation3 + $0x68] sm:$0xff] %vm405_vm0, %v2838_v1 }
  0x3c   : > { %420 = vst.msk [vmem:[#allocation3 + $0x70] sm:$0xff] %vm405_vm0, %v2838_v1  ;;  %421 = vst.msk [vmem:[#allocation3 + $0x78] sm:$0xff] %vm405_vm0, %v2838_v1 }
  0x3d   : > { %422 = vst.msk [vmem:[#allocation4] sm:$0xff] %vm405_vm0, %v2837_v0  ;;  %423 = vst.msk [vmem:[#allocation4 + $0x8] sm:$0xff] %vm405_vm0, %v2837_v0 }
  0x3e   : > { %424 = vst.msk [vmem:[#allocation4 + $0x10] sm:$0xff] %vm405_vm0, %v2837_v0  ;;  %425 = vst.msk [vmem:[#allocation4 + $0x18] sm:$0xff] %vm405_vm0, %v2837_v0 }
  0x3f   : > { %426 = vst.msk [vmem:[#allocation4 + $0x20] sm:$0xff] %vm405_vm0, %v2837_v0  ;;  %427 = vst.msk [vmem:[#allocation4 + $0x28] sm:$0xff] %vm405_vm0, %v2837_v0 }
  0x40   : > { %428 = vst.msk [vmem:[#allocation4 + $0x30] sm:$0xff] %vm405_vm0, %v2837_v0  ;;  %429 = vst.msk [vmem:[#allocation4 + $0x38] sm:$0xff] %vm405_vm0, %v2837_v0 }
  0x41   : > { %430 = vst.msk [vmem:[#allocation4 + $0x40] sm:$0xff] %vm405_vm0, %v2837_v0  ;;  %431 = vst.msk [vmem:[#allocation4 + $0x48] sm:$0xff] %vm405_vm0, %v2837_v0 }
  0x42   : > { %432 = vst.msk [vmem:[#allocation4 + $0x50] sm:$0xff] %vm405_vm0, %v2837_v0  ;;  %433 = vst.msk [vmem:[#allocation4 + $0x58] sm:$0xff] %vm405_vm0, %v2837_v0 }
  0x43   : > { %434 = vst.msk [vmem:[#allocation4 + $0x60] sm:$0xff] %vm405_vm0, %v2837_v0  ;;  %435 = vst.msk [vmem:[#allocation4 + $0x68] sm:$0xff] %vm405_vm0, %v2837_v0 }
  0x44   : > { %436 = vst.msk [vmem:[#allocation4 + $0x70] sm:$0xff] %vm405_vm0, %v2837_v0  ;;  %437 = vst.msk [vmem:[#allocation4 + $0x78] sm:$0xff] %vm405_vm0, %v2837_v0 }
  0x45 PF: > { %v438_v2 = vld [vmem:[%s3003_s11] sm:$0xf]  ;;  %vm520_vm1 = vcmask 1043456   ;;  %vm495_vm2 = vcmask 64512   ;;  %v2563_v5 = vld [vmem:[%s3680_s2 + $0x8] sm:$0xff]   ;;  %v2564_v6 = vld [vmem:[%s3680_s2 + $0x10] sm:$0xff]   ;;  %s3709_s26 = scalar_lea.vmem %s3686_s8, %s2993_s28 }
  0x46   : > { %v2562_v3 = vld [vmem:[%s3680_s2] sm:$0xff]   ;;  %2461 = vmatprep.subr.msk.bf16.mxu0 %vm520_vm1, %v438_v2  ;;  %v522_v4 = vsel %vm520_vm1, %v438_v2, 0  ;;  %2462 = vmatprep.subr.msk.bf16.mxu1 %vm520_vm1, %v438_v2  ;;  %v2565_v7 = vld [vmem:[%s3680_s2 + $0x18] sm:$0xff]   ;;  %v2571_v10 = vld [vmem:[%s3681_s3 + $0x8] sm:$0xff]   ;;  %v2839_v27 = vmov 0   ;;  %vm1141_vm3 = vcmask 7168  }
  0x47   : > { %2320 = vmatpush3.bf16.msra.mxu0 %v522_v4  ;;  %2321 = vmatprep.mubr.msk.bf16.mxu0 %vm495_vm2, %v2562_v3  ;;  %v2566_v8 = vld [vmem:[%s3680_s2 + $0x20] sm:$0xff]   ;;  %v2572_v11 = vld [vmem:[%s3681_s3 + $0x10] sm:$0xff]   ;;  %v2573_v12 = vld [vmem:[%s3681_s3 + $0x18] sm:$0xff]  }
  0x48   : > { %2338 = vmatpush3.bf16.msra.mxu1 %v522_v4  ;;  %v2570_v9 = vld [vmem:[%s3681_s3] sm:$0xff]   ;;  %v2567_v13 = vld [vmem:[%s3680_s2 + $0x28] sm:$0xff]   ;;  %v2568_v15 = vld [vmem:[%s3680_s2 + $0x30] sm:$0xff]   ;;  %2560 = vset.pattern.permute.xlu1 %v2839_v27 }
  0x49   : > { %2339 = vmatprep.mubr.msk.bf16.mxu1 %vm495_vm2, %v2570_v9  ;;  %v2574_v14 = vld [vmem:[%s3681_s3 + $0x20] sm:$0xff]   ;;  %v2575_v16 = vld [vmem:[%s3681_s3 + $0x28] sm:$0xff]   ;;  %v2569_v17 = vld [vmem:[%s3680_s2 + $0x38] sm:$0xff]   ;;  %2561 = vset.pattern.permute.xlu0 %v2839_v27 }
  0x4a   : > { %2322 = vmatmul.mubr.msk.bf16.vlgmr.msra.gmra.mxu0 %vm495_vm2, %v2563_v5  ;;  %v2576_v18 = vld [vmem:[%s3681_s3 + $0x30] sm:$0xff]   ;;  %v2577_v19 = vld [vmem:[%s3681_s3 + $0x38] sm:$0xff]   ;;  %v799_v0 = vld [vmem:[#allocation3] sm:$0xff] }
  0x4b   : > { %2325 = vmatprep.mubr.msk.bf16.mxu0 %vm495_vm2, %v2564_v6  ;;  %2340 = vmatmul.mubr.msk.bf16.vlgmr.msra.gmra.mxu1 %vm495_vm2, %v2571_v10  ;;  %v3153_v61 = vld [vmem:[#allocation3 + $0x10] sm:$0xff]  ;;  %v3158_v1 = vld [vmem:[#allocation3 + $0x18] sm:$0xff]  ;;  %v3164_v6 = vld [vmem:[#allocation3 + $0x8] sm:$0xff] }
  0x4c   : > { %2343 = vmatprep.mubr.msk.bf16.mxu1 %vm495_vm2, %v2572_v11  ;;  %v3169_v9 = vld [vmem:[#allocation3 + $0x30] sm:$0xff]  ;;  %v3171_v10 = vld [vmem:[#allocation3 + $0x38] sm:$0xff] }
  0x52   : > { %2326 = vmatmul.mubr.msk.bf16.gmra.mxu0 %vm495_vm2, %v2565_v7 }
  0x53   : > { %2329 = vmatprep.mubr.msk.bf16.mxu0 %vm495_vm2, %v2566_v8  ;;  %2344 = vmatmul.mubr.msk.bf16.gmra.mxu1 %vm495_vm2, %v2573_v12 }
  0x54   : > { %2347 = vmatprep.mubr.msk.bf16.mxu1 %vm495_vm2, %v2574_v14 }
  0x5a   : > { %2330 = vmatmul.mubr.msk.bf16.gmra.mxu0 %vm495_vm2, %v2567_v13 }
  0x5b   : > { %2333 = vmatprep.mubr.msk.bf16.mxu0 %vm495_vm2, %v2568_v15  ;;  %2348 = vmatmul.mubr.msk.bf16.gmra.mxu1 %vm495_vm2, %v2575_v16  ;;  %v3180_v15 = vld [vmem:[#allocation3 + $0x20] sm:$0xff]  ;;  %v3182_v16 = vld [vmem:[#allocation3 + $0x28] sm:$0xff] }
  0x5c   : > { %2351 = vmatprep.mubr.msk.bf16.mxu1 %vm495_vm2, %v2576_v18 }
  0x62   : > { %2334 = vmatmul.mubr.msk.bf16.gmra.mxu0 %vm495_vm2, %v2569_v17 }
  0x63   : > { %2352 = vmatmul.mubr.msk.bf16.gmra.mxu1 %vm495_vm2, %v2577_v19 }
 0x10a   : > { %v3105_v20 = vpop.f32.mrf.mxu0 }
 0x10b   : > { %819 = vmax.xlane.f32.xlu0 %v3105_v20  ;;  %v2341_v30 = vpop.f32.mrf.mxu1 }
 0x10c   : > { %v3108_v21 = vpop.f32.mrf.mxu0 }
 0x10d   : > { %v735_v32 = vpop.f32.mrf.mxu1 }
 0x10e   : > { %v3110_v22 = vpop.f32.mrf.mxu0 }
 0x10f   : > { %815 = vmax.xlane.f32.xlu0 %v3108_v21  ;;  %821 = vmax.xlane.f32.xlu1 %v3110_v22  ;;  %v2342_v34 = vpop.f32.mrf.mxu1 }
 0x110   : > { %v3114_v23 = vpop.f32.mrf.mxu0  ;;  %v1279_v39 = vpack.c.bf16 %v2342_v34, %v2341_v30  ;;  %v3194_v30 = vld [vmem:[#allocation3 + $0x50] sm:$0xff] }
 0x111   : > { %v738_v36 = vpop.f32.mrf.mxu1 }
 0x112   : > { %v3116_v24 = vpop.f32.mrf.mxu0  ;;  %v1278_v40 = vpack.c.bf16 %v738_v36, %v735_v32  ;;  %v3196_v32 = vld [vmem:[#allocation3 + $0x40] sm:$0xff] }
 0x113   : > { %817 = vmax.xlane.f32.xlu0 %v3114_v23  ;;  %v2345_v38 = vpop.f32.mrf.mxu1 }
 0x114   : > { %v3119_v25 = vpop.f32.mrf.mxu0 }
 0x115   : > { %v751_v42 = vpop.f32.mrf.mxu1 }
 0x116   : > { %v3121_v26 = vpop.f32.mrf.mxu0 }
 0x117   : > { %827 = vmax.xlane.f32.xlu0 %v3116_v24  ;;  %829 = vmax.xlane.f32.xlu1 %v3121_v26  ;;  %v2346_v43 = vpop.f32.mrf.mxu1 }
 0x118   : > { %v3125_v28 = vpop.f32.mrf.mxu0  ;;  %v1281_v59 = vpack.c.bf16 %v2346_v43, %v2345_v38 }
 0x119   : > { %v754_v44 = vpop.f32.mrf.mxu1 }
 0x11a   : > { %v3127_v29 = vpop.f32.mrf.mxu0  ;;  %v1280_v60 = vpack.c.bf16 %v754_v44, %v751_v42  ;;  %v3218_v44 = vld [vmem:[#allocation3 + $0x60] sm:$0xff] }
 0x11b   : > { %823 = vmax.xlane.f32.xlu0 %v3119_v25  ;;  %825 = vmax.xlane.f32.xlu1 %v3125_v28  ;;  %v2349_v46 = vpop.f32.mrf.mxu1 }
 0x11c   : > { %v3131_v31 = vpop.f32.mrf.mxu0 }
 0x11d   : > { %v767_v47 = vpop.f32.mrf.mxu1 }
 0x11e   : > { %v3133_v33 = vpop.f32.mrf.mxu0 }
 0x11f   : > { %835 = vmax.xlane.f32.xlu0 %v3127_v29  ;;  %831 = vmax.xlane.f32.xlu1 %v3131_v31  ;;  %v2350_v49 = vpop.f32.mrf.mxu1 }
 0x120   : > { %v3137_v35 = vpop.f32.mrf.mxu0  ;;  %v1283_v56 = vpack.c.bf16 %v2350_v49, %v2349_v46 }
 0x121   : > { %v770_v50 = vpop.f32.mrf.mxu1 }
 0x122   : > { %v3139_v37 = vpop.f32.mrf.mxu0  ;;  %v1282_v58 = vpack.c.bf16 %v770_v50, %v767_v47  ;;  %v3221_v47 = vld [vmem:[#allocation3 + $0x48] sm:$0xff] }
 0x123   : > { %837 = vmax.xlane.f32.xlu1 %v3133_v33  ;;  %v2353_v51 = vpop.f32.mrf.mxu1 }
 0x124   : > { %v3142_v41 = vpop.f32.mrf.mxu0 }
 0x125   : > { %839 = vmax.xlane.f32.xlu0 %v3142_v41  ;;  %v783_v52 = vpop.f32.mrf.mxu1 }
 0x126   : > { %v3147_v45 = vpop.f32.mrf.mxu0 }
 0x127   : > { %833 = vmax.xlane.f32.xlu1 %v3137_v35  ;;  %v2354_v53 = vpop.f32.mrf.mxu1 }
 0x128   : > { %v3150_v48 = vpop.f32.mrf.mxu0  ;;  %v1285_v54 = vpack.c.bf16 %v2354_v53, %v2353_v51 }
 0x129   : > { %843 = vmax.xlane.f32.xlu0 %v3139_v37  ;;  %v786_v55 = vpop.f32.mrf.mxu1 }
 0x12a   : > { %2355 = vmatprep.subr.bf16.mxu0 %v1285_v54  ;;  %2445 = vmatprep.subr.bf16.mxu1 %v1285_v54  ;;  %v1284_v57 = vpack.c.bf16 %v786_v55, %v783_v52 }
 0x12b   : > { %845 = vmax.xlane.f32.xlu1 %v3147_v45  ;;  %2356 = vmatpush3.bf16.xpose.msra.mxu0 %v1285_v54 }
 0x12c   : > { %2453 = vmatpush3.bf16.xpose.msra.mxu1 %v1285_v54  ;;  %2357 = vmatprep.subr.bf16.mxu0 %v1284_v57  ;;  %v3229_v54 = vld [vmem:[#allocation3 + $0x70] sm:$0xff] }
 0x12d   : > { %2446 = vmatprep.subr.bf16.mxu1 %v1284_v57 }
 0x12f   : > { %841 = vmax.xlane.f32.xlu1 %v3150_v48 }
 0x133   : > { %2358 = vmatpush3.bf16.xpose.msra.mxu0 %v1284_v57 }
 0x134   : > { %2454 = vmatpush3.bf16.xpose.msra.mxu1 %v1284_v57  ;;  %2359 = vmatprep.subr.bf16.mxu0 %v1283_v56 }
 0x135   : > { %2447 = vmatprep.subr.bf16.mxu1 %v1283_v56 }
 0x13b   : > { %2360 = vmatpush3.bf16.xpose.msra.mxu0 %v1283_v56 }
 0x13c   : > { %2455 = vmatpush3.bf16.xpose.msra.mxu1 %v1283_v56  ;;  %2361 = vmatprep.subr.bf16.mxu0 %v1282_v58 }
 0x13d   : > { %2448 = vmatprep.subr.bf16.mxu1 %v1282_v58 }
 0x143   : > { %2362 = vmatpush3.bf16.xpose.msra.mxu0 %v1282_v58 }
 0x144   : > { %2456 = vmatpush3.bf16.xpose.msra.mxu1 %v1282_v58  ;;  %2363 = vmatprep.subr.bf16.mxu0 %v1281_v59  ;;  %v3235_v58 = vld [vmem:[#allocation3 + $0x78] sm:$0xff] }
 0x145   : > { %2449 = vmatprep.subr.bf16.mxu1 %v1281_v59 }
 0x14b   : > { %2364 = vmatpush3.bf16.xpose.msra.mxu0 %v1281_v59 }
 0x14c   : > { %2457 = vmatpush3.bf16.xpose.msra.mxu1 %v1281_v59  ;;  %2365 = vmatprep.subr.bf16.mxu0 %v1280_v60 }
 0x14d   : > { %2450 = vmatprep.subr.bf16.mxu1 %v1280_v60 }
 0x153   : > { %2366 = vmatpush3.bf16.xpose.msra.mxu0 %v1280_v60 }
 0x154   : > { %2458 = vmatpush3.bf16.xpose.msra.mxu1 %v1280_v60  ;;  %2367 = vmatprep.subr.bf16.mxu0 %v1279_v39 }
 0x155   : > { %2451 = vmatprep.subr.bf16.mxu1 %v1279_v39 }
 0x15b   : > { %2368 = vmatpush3.bf16.xpose.msra.mxu0 %v1279_v39 }
 0x15c   : > { %2459 = vmatpush3.bf16.xpose.msra.mxu1 %v1279_v39  ;;  %2369 = vmatprep.subr.bf16.mxu0 %v1278_v40 }
 0x15d   : > { %2452 = vmatprep.subr.bf16.mxu1 %v1278_v40 }
 0x163   : > { %2370 = vmatpush3.bf16.xpose.msra.mxu0 %v1278_v40 }
 0x164   : > { %2460 = vmatpush3.bf16.xpose.msra.mxu1 %v1278_v40  ;;  %v3210_v40 = vld [vmem:[#allocation3 + $0x58] sm:$0xff] }
 0x194   : > { %v820_v62 = vpop.xlane.xlu0 %819 }
 0x195   : > { %v3156_v63 = vmax.f32 %v3153_v61, %v820_v62 }
 0x197   : > { %1417 = vst.msk [vmem:[#allocation3 + $0x10] sm:$0xff] %vm1141_vm3, %v3156_v63  ;;  %923 = vperm.xlu1 %2560, %v3156_v63   ;;  %v865_v60 = vsub.f32 %v3153_v61, %v3156_v63 }
 0x198   : > { %v816_v2 = vpop.xlane.xlu0 %815  ;;  %v822_v3 = vpop.xlane.xlu1 %821 }
 0x199   : > { %v847_v4 = vmax.f32 %v799_v0, %v816_v2  ;;  %v850_v5 = vmax.f32 %v3158_v1, %v822_v3  ;;  %v883_v63 = vmul.f32 1.442695, %v865_v60 }
 0x19b   : > { %1415 = vst.msk [vmem:[#allocation3] sm:$0xff] %vm1141_vm3, %v847_v4  ;;  %1418 = vst.msk [vmem:[#allocation3 + $0x18] sm:$0xff] %vm1141_vm3, %v850_v5  ;;  %913 = vperm.xlu0 %2561, %v847_v4   ;;  %928 = vperm.xlu1 %2560, %v850_v5   ;;  %v863_v42 = vsub.f32 %v799_v0, %v847_v4  ;;  %v866_v52 = vsub.f32 %v3158_v1, %v850_v5  ;;  %v812_v5 = vld [vmem:[#allocation3 + $0x68] sm:$0xff] }
 0x19c   : > { %v818_v7 = vpop.xlane.xlu0 %817 }
 0x19d   : > { %v848_v8 = vmax.f32 %v3164_v6, %v818_v7  ;;  %v879_v51 = vmul.f32 1.442695, %v863_v42  ;;  %v885_v62 = vmul.f32 1.442695, %v866_v52 }
 0x19f   : > { %1416 = vst.msk [vmem:[#allocation3 + $0x8] sm:$0xff] %vm1141_vm3, %v848_v8  ;;  %918 = vperm.xlu1 %2560, %v848_v8   ;;  %v864_v55 = vsub.f32 %v3164_v6, %v848_v8  ;;  %2578 = vpow2.f32 %v879_v51 }
 0x1a0   : > { %v828_v11 = vpop.xlane.xlu0 %827  ;;  %v830_v12 = vpop.xlane.xlu1 %829  ;;  %2580 = vpow2.f32 %v885_v62 }
 0x1a1   : > { %v3175_v13 = vmax.f32 %v3169_v9, %v828_v11  ;;  %v3178_v14 = vmax.f32 %v3171_v10, %v830_v12  ;;  %v881_v1 = vmul.f32 1.442695, %v864_v55 }
 0x1a3   : > { %1421 = vst.msk [vmem:[#allocation3 + $0x30] sm:$0xff] %vm1141_vm3, %v3175_v13  ;;  %1422 = vst.msk [vmem:[#allocation3 + $0x38] sm:$0xff] %vm1141_vm3, %v3178_v14  ;;  %v870_v2 = vsub.f32 %v3171_v10, %v3178_v14  ;;  %2582 = vpow2.f32 %v881_v1  ;;  %v869_v12 = vsub.f32 %v3169_v9, %v3175_v13 }
 0x1a4   : > { %v824_v17 = vpop.xlane.xlu0 %823  ;;  %v826_v18 = vpop.xlane.xlu1 %825  ;;  %2584 = vpow2.f32 %v883_v63 }
 0x1a5   : > { %v3189_v19 = vmax.f32 %v3180_v15, %v824_v17  ;;  %v3192_v27 = vmax.f32 %v3182_v16, %v826_v18  ;;  %v893_v8 = vmul.f32 1.442695, %v870_v2 }
 0x1a7   : > { %1419 = vst.msk [vmem:[#allocation3 + $0x20] sm:$0xff] %vm1141_vm3, %v3189_v19  ;;  %1420 = vst.msk [vmem:[#allocation3 + $0x28] sm:$0xff] %vm1141_vm3, %v3192_v27  ;;  %938 = vperm.xlu0 %2561, %v3192_v27   ;;  %933 = vperm.xlu1 %2560, %v3189_v19   ;;  %v867_v6 = vsub.f32 %v3180_v15, %v3189_v19  ;;  %v868_v10 = vsub.f32 %v3182_v16, %v3192_v27  ;;  %2586 = vpow2.f32 %v893_v8 }
 0x1a8   : > { %v836_v34 = vpop.xlane.xlu0 %835  ;;  %v832_v36 = vpop.xlane.xlu1 %831  ;;  %v891_v16 = vmul.f32 1.442695, %v869_v12 }
 0x1a9   : > { %v3205_v38 = vmax.f32 %v3194_v30, %v836_v34  ;;  %v3208_v39 = vmax.f32 %v3196_v32, %v832_v36  ;;  %v889_v17 = vmul.f32 1.442695, %v868_v10 }
 0x1ab   : > { %1425 = vst.msk [vmem:[#allocation3 + $0x50] sm:$0xff] %vm1141_vm3, %v3205_v38  ;;  %1423 = vst.msk [vmem:[#allocation3 + $0x40] sm:$0xff] %vm1141_vm3, %v3208_v39  ;;  %948 = vperm.xlu0 %2561, %v3178_v14   ;;  %963 = vperm.xlu1 %2560, %v3205_v38   ;;  %v887_v14 = vmul.f32 1.442695, %v867_v6  ;;  %v873_v18 = vsub.f32 %v3194_v30, %v3205_v38  ;;  %v871_v34 = vsub.f32 %v3196_v32, %v3208_v39 }
 0x1ac   : > { %v838_v43 = vpop.xlane.xlu1 %837  ;;  %v3269_v19 = vpop.eup %2578 }
 0x1ad   : > { %v858_v46 = vmax.f32 %v3210_v40, %v838_v43  ;;  %2588 = vpow2.f32 %v887_v14  ;;  %v3276_v36 = vpop.eup %2580  ;;  %v895_v42 = vmul.f32 1.442695, %v871_v34  ;;  %v3326_v14 = vld [vmem:[%s3709_s26] ss:$0 sm:$0xff] }
 0x1ae   : > { %v840_v49 = vpop.xlane.xlu0 %839  ;;  %2590 = vpow2.f32 %v889_v17 }
 0x1af   : > { %1426 = vst.msk [vmem:[#allocation3 + $0x58] sm:$0xff] %vm1141_vm3, %v858_v46  ;;  %953 = vperm.xlu1 %2560, %v3208_v39   ;;  %v3226_v50 = vmax.f32 %v3218_v44, %v840_v49  ;;  %v874_v15 = vsub.f32 %v3210_v40, %v858_v46  ;;  %2592 = vpow2.f32 %v891_v16 }
 0x1b0   : > { %v834_v53 = vpop.xlane.xlu1 %833  ;;  %v3278_v38 = vpop.eup %2582 }
 0x1b1   : > { %v856_v56 = vmax.f32 %v3221_v47, %v834_v53  ;;  %1427 = vst.msk [vmem:[#allocation3 + $0x60] sm:$0xff] %vm1141_vm3, %v3226_v50  ;;  %v901_v27 = vmul.f32 1.442695, %v874_v15  ;;  %v3282_v43 = vpop.eup %2584 }
 0x1b2   : > { %v844_v57 = vpop.xlane.xlu0 %843 }
 0x1b3   : > { %1424 = vst.msk [vmem:[#allocation3 + $0x48] sm:$0xff] %vm1141_vm3, %v856_v56  ;;  %968 = vperm.xlu1 %2560, %v858_v46   ;;  %v3239_v59 = vmax.f32 %v3229_v54, %v844_v57  ;;  %v872_v9 = vsub.f32 %v3221_v47, %v856_v56  ;;  %2594 = vpow2.f32 %v901_v27  ;;  %v875_v46 = vsub.f32 %v3218_v44, %v3226_v50 }
 0x1b4   : > { %v846_v0 = vpop.xlane.xlu1 %845  ;;  %v3286_v39 = vpop.eup %2586 }
 0x1b5   : > { %v877_v3 = vsub.f32 %v3229_v54, %v3239_v59  ;;  %1429 = vst.msk [vmem:[#allocation3 + $0x70] sm:$0xff] %vm1141_vm3, %v3239_v59  ;;  %v3250_v4 = vmax.f32 %v3235_v58, %v846_v0  ;;  %v897_v40 = vmul.f32 1.442695, %v872_v9  ;;  %v903_v49 = vmul.f32 1.442695, %v875_v46 }
 0x1b7   : > { %v878_v61 = vsub.f32 %v3235_v58, %v3250_v4  ;;  %1430 = vst.msk [vmem:[#allocation3 + $0x78] sm:$0xff] %vm1141_vm3, %v3250_v4  ;;  %958 = vperm.xlu1 %2560, %v856_v56  }
 0x1b8   : > { %v842_v7 = vpop.xlane.xlu1 %841 }
 0x1b9   : > { %v860_v11 = vmax.f32 %v812_v5, %v842_v7 }
 0x1ba   : > { %v3290_v47 = vpop.eup %2588 }
 0x1bb   : > { %1428 = vst.msk [vmem:[#allocation3 + $0x68] sm:$0xff] %vm1141_vm3, %v860_v11  ;;  %943 = vperm.xlu1 %2560, %v3175_v13   ;;  %978 = vperm.xlu0 %2561, %v860_v11   ;;  %v899_v13 = vmul.f32 1.442695, %v873_v18  ;;  %v876_v30 = vsub.f32 %v812_v5, %v860_v11  ;;  %v3292_v51 = vpop.eup %2590 }
 0x1bc   : > { %v3296_v52 = vpop.eup %2592 }
 0x1bd   : > { %2596 = vpow2.f32 %v899_v13  ;;  %v905_v32 = vmul.f32 1.442695, %v876_v30 }
 0x1be   : > { %2598 = vpow2.f32 %v897_v40 }
 0x1bf   : > { %973 = vperm.xlu1 %2560, %v3226_v50   ;;  %988 = vperm.xlu0 %2561, %v3250_v4   ;;  %2600 = vpow2.f32 %v895_v42 }
 0x1c0   : > { %2602 = vpow2.f32 %v905_v32  ;;  %v3298_v44 = vpop.eup %2594 }
 0x1c1   : > { %2604 = vpow2.f32 %v903_v49 }
 0x1c3   : > { %983 = vperm.xlu1 %2560, %v3239_v59   ;;  %1176 = vperm.xlu0 %2561, %v3269_v19  }
 0x1c7   : > { %1181 = vperm.xlu1 %2560, %v3278_v38   ;;  %1191 = vperm.xlu0 %2561, %v3276_v36  }
 0x1ca   : > { %v3302_v50 = vpop.eup %2596 }
 0x1cb   : > { %1186 = vperm.xlu1 %2560, %v3282_v43   ;;  %1211 = vperm.xlu0 %2561, %v3286_v39   ;;  %v3304_v53 = vpop.eup %2598 }
 0x1cc   : > { %v3308_v55 = vpop.eup %2600 }
 0x1cd   : > { %v3310_v56 = vpop.eup %2602 }
 0x1ce   : > { %v3314_v57 = vpop.eup %2604 }
 0x1cf   : > { %1196 = vperm.xlu1 %2560, %v3290_v47   ;;  %1201 = vperm.xlu0 %2561, %v3292_v51  }
 0x1d3   : > { %1206 = vperm.xlu1 %2560, %v3296_v52   ;;  %1231 = vperm.xlu0 %2561, %v3298_v44  }
 0x1d7   : > { %1226 = vperm.xlu1 %2560, %v3302_v50   ;;  %1221 = vperm.xlu0 %2561, %v3304_v53  }
 0x1db   : > { %1216 = vperm.xlu1 %2560, %v3308_v55   ;;  %1241 = vperm.xlu0 %2561, %v3310_v56  }
 0x1df   : > { %1236 = vperm.xlu1 %2560, %v3314_v57  }
 0x212   : > { %v924_v60 = vpop.permute.xlu1 %923 }
 0x213   : > { %v993_v62 = vsub.f32 %v3105_v20, %v924_v60 }
 0x215   : > { %v1011_v0 = vmul.f32 1.442695, %v993_v62 }
 0x216   : > { %v914_v1 = vpop.permute.xlu0 %913  ;;  %v929_v2 = vpop.permute.xlu1 %928 }
 0x217   : > { %2606 = vpow2.f32 %v1011_v0  ;;  %v991_v5 = vsub.f32 %v3108_v21, %v914_v1  ;;  %v994_v63 = vsub.f32 %v3110_v22, %v929_v2 }
 0x219   : > { %v1007_v6 = vmul.f32 1.442695, %v991_v5  ;;  %v1013_v7 = vmul.f32 1.442695, %v994_v63 }
 0x21a   : > { %v919_v8 = vpop.permute.xlu1 %918 }
 0x21b   : > { %2608 = vpow2.f32 %v1007_v6  ;;  %v992_v10 = vsub.f32 %v3114_v23, %v919_v8 }
 0x21c   : > { %2610 = vpow2.f32 %v1013_v7 }
 0x21d   : > { %v1009_v11 = vmul.f32 1.442695, %v992_v10 }
 0x21f   : > { %2612 = vpow2.f32 %v1009_v11 }
 0x222   : > { %v939_v12 = vpop.permute.xlu0 %938  ;;  %v934_v20 = vpop.permute.xlu1 %933 }
 0x223   : > { %v996_v21 = vsub.f32 %v3125_v28, %v939_v12  ;;  %v995_v22 = vsub.f32 %v3119_v25, %v934_v20 }
 0x224   : > { %v2607_v17 = vpop.eup %2606 }
 0x225   : > { %v1017_v15 = vmul.f32 1.442695, %v996_v21  ;;  %v1015_v16 = vmul.f32 1.442695, %v995_v22  ;;  %v1047_v23 = vmul.f32 %v2607_v17, %v3326_v14 }
 0x226   : > { %v949_v18 = vpop.permute.xlu0 %948  ;;  %v964_v27 = vpop.permute.xlu1 %963 }
 0x227   : > { %2614 = vpow2.f32 %v1017_v15  ;;  %v998_v9 = vsub.f32 %v3121_v26, %v949_v18  ;;  %1097 = vadd.xlane.f32.xlu0 %v1047_v23  ;;  %v1001_v49 = vsub.f32 %v3127_v29, %v964_v27 }
 0x228   : > { %v2609_v13 = vpop.eup %2608  ;;  %2616 = vpow2.f32 %v1015_v16 }
 0x229   : > { %v2611_v34 = vpop.eup %2610  ;;  %v1021_v40 = vmul.f32 1.442695, %v998_v9  ;;  %v1045_v30 = vmul.f32 %v2609_v13, %v3326_v14  ;;  %v1027_v5 = vmul.f32 1.442695, %v1001_v49 }
 0x22a   : > { %v954_v28 = vpop.permute.xlu1 %953  ;;  %v1048_v42 = vmul.f32 %v2611_v34, %v3326_v14 }
 0x22b   : > { %2618 = vpow2.f32 %v1021_v40  ;;  %1093 = vadd.xlane.f32.xlu1 %v1045_v30  ;;  %v999_v46 = vsub.f32 %v3131_v31, %v954_v28 }
 0x22c   : > { %v2613_v25 = vpop.eup %2612  ;;  %v1271_v0 = vpack.c.bf16 %v1048_v42, %v1047_v23 }
 0x22d   : > { %v1046_v32 = vmul.f32 %v2613_v25, %v3326_v14  ;;  %v1023_v1 = vmul.f32 1.442695, %v999_v46 }
 0x22e   : > { %v969_v26 = vpop.permute.xlu1 %968 }
 0x22f   : > { %v1002_v60 = vsub.f32 %v3133_v33, %v969_v26  ;;  %1099 = vadd.xlane.f32.xlu1 %v1048_v42  ;;  %1095 = vadd.xlane.f32.xlu0 %v1046_v32  ;;  %v1270_v62 = vpack.c.bf16 %v1046_v32, %v1045_v30 }
 0x231   : > { %v1029_v2 = vmul.f32 1.442695, %v1002_v60  ;;  %2371 = vmatprep.mubr.bf16.mxu0 %v1270_v62 }
 0x232   : > { %2372 = vmatmul.mubr.bf16.vlgmr.msra.gmra.mxu0 %v1271_v0  ;;  %v959_v63 = vpop.permute.xlu1 %958 }
 0x233   : > { %2620 = vpow2.f32 %v1029_v2  ;;  %v1000_v31 = vsub.f32 %v3137_v35, %v959_v63 }
 0x234   : > { %v2615_v6 = vpop.eup %2614  ;;  %2622 = vpow2.f32 %v1023_v1 }
 0x235   : > { %v2617_v7 = vpop.eup %2616  ;;  %v1025_v29 = vmul.f32 1.442695, %v1000_v31  ;;  %v1050_v8 = vmul.f32 %v2615_v6, %v3326_v14  ;;  %2624 = vpow2.f32 %v1027_v5 }
 0x236   : > { %v979_v33 = vpop.permute.xlu0 %978  ;;  %v944_v10 = vpop.permute.xlu1 %943  ;;  %v1049_v11 = vmul.f32 %v2617_v7, %v3326_v14 }
 0x237   : > { %2626 = vpow2.f32 %v1025_v29  ;;  %v1004_v12 = vsub.f32 %v3150_v48, %v979_v33  ;;  %v997_v20 = vsub.f32 %v3116_v24, %v944_v10  ;;  %v907_v29 = vmul.f32 1.442695, %v877_v3 }
 0x238   : > { %v2619_v21 = vpop.eup %2618  ;;  %v1272_v22 = vpack.c.bf16 %v1050_v8, %v1049_v11  ;;  %v909_v10 = vmul.f32 1.442695, %v878_v61 }
 0x239   : > { %v1019_v17 = vmul.f32 1.442695, %v997_v20  ;;  %v1052_v35 = vmul.f32 %v2619_v21, %v3326_v14  ;;  %v1033_v15 = vmul.f32 1.442695, %v1004_v12 }
 0x23a   : > { %2375 = vmatprep.mubr.bf16.mxu0 %v1272_v22  ;;  %v989_v16 = vpop.permute.xlu0 %988  ;;  %v974_v23 = vpop.permute.xlu1 %973 }
 0x23b   : > { %v1006_v18 = vsub.f32 %v3147_v45, %v989_v16  ;;  %v1003_v27 = vsub.f32 %v3142_v41, %v974_v23  ;;  %1107 = vadd.xlane.f32.xlu1 %v1052_v35  ;;  %2628 = vpow2.f32 %v1019_v17 }
 0x23c   : > { %2630 = vpow2.f32 %v1033_v15  ;;  %v1063_v15 = vld [vmem:[#allocation4 + $0x10] sm:$0xff] }
 0x23d   : > { %v1037_v9 = vmul.f32 1.442695, %v1006_v18  ;;  %v1031_v13 = vmul.f32 1.442695, %v1003_v27  ;;  %v1079_v16 = vmul.f32 %v3282_v43, %v1063_v15  ;;  %v1061_v27 = vld [vmem:[#allocation4] sm:$0xff]  ;;  %v1074_v15 = vld [vmem:[#allocation4 + $0x68] sm:$0xff] }
 0x23e   : > { %v984_v48 = vpop.permute.xlu1 %983  ;;  %v3365_v59 = vpop.permute.xlu0 %1176 }
 0x23f   : > { %2632 = vpow2.f32 %v1037_v9  ;;  %v1005_v24 = vsub.f32 %v3139_v37, %v984_v48  ;;  %1103 = vadd.xlane.f32.xlu1 %v1050_v8 }
 0x240   : > { %v2621_v34 = vpop.eup %2620  ;;  %2634 = vpow2.f32 %v1031_v13  ;;  %v1077_v13 = vmul.f32 %v3269_v19, %v1061_v27 }
 0x241   : > { %v1035_v40 = vmul.f32 1.442695, %v1005_v24  ;;  %v1056_v30 = vmul.f32 %v2621_v34, %v3326_v14  ;;  %v2623_v28 = vpop.eup %2622  ;;  %v1062_v24 = vld [vmem:[#allocation4 + $0x8] sm:$0xff]  ;;  %v1064_v34 = vld [vmem:[#allocation4 + $0x18] sm:$0xff] }
 0x242   : > { %v2625_v25 = vpop.eup %2624  ;;  %v1053_v45 = vmul.f32 %v2623_v28, %v3326_v14  ;;  %v3367_v3 = vpop.permute.xlu1 %1181  ;;  %v1080_v28 = vmul.f32 %v3276_v36, %v1064_v34  ;;  %v1072_v36 = vld [vmem:[#allocation4 + $0x58] sm:$0xff] }
 0x243   : > { %2636 = vpow2.f32 %v1035_v40  ;;  %1115 = vadd.xlane.f32.xlu1 %v1056_v30  ;;  %v1055_v46 = vmul.f32 %v2625_v25, %v3326_v14 }
 0x244   : > { %v2627_v41 = vpop.eup %2626  ;;  %2638 = vpow2.f32 %v907_v29 }
 0x245   : > { %v1054_v42 = vmul.f32 %v2627_v41, %v3326_v14  ;;  %v1275_v37 = vpack.c.bf16 %v1056_v30, %v1055_v46  ;;  %2640 = vpow2.f32 %v909_v10  ;;  %v1078_v30 = vmul.f32 %v3278_v38, %v1062_v24  ;;  %v1069_v24 = vld [vmem:[#allocation4 + $0x40] sm:$0xff] }
 0x247   : > { %1111 = vadd.xlane.f32.xlu1 %v1054_v42  ;;  %v1274_v32 = vpack.c.bf16 %v1054_v42, %v1053_v45  ;;  %v1068_v42 = vld [vmem:[#allocation4 + $0x38] sm:$0xff] }
 0x248   : > { %v2629_v49 = vpop.eup %2628  ;;  %v1084_v19 = vmul.f32 %v3286_v39, %v1068_v42 }
 0x249   : > { %2379 = vmatprep.mubr.bf16.mxu1 %v1274_v32  ;;  %v1051_v26 = vmul.f32 %v2629_v49, %v3326_v14  ;;  %v2631_v60 = vpop.eup %2630  ;;  %v1066_v32 = vld [vmem:[#allocation4 + $0x28] sm:$0xff] }
 0x24a   : > { %2380 = vmatmul.mubr.bf16.vlgmr.msra.gmra.mxu1 %v1275_v37  ;;  %v1058_v63 = vmul.f32 %v2631_v60, %v3326_v14  ;;  %v1082_v38 = vmul.f32 %v3292_v51, %v1066_v32  ;;  %v1088_v60 = vmul.f32 %v3298_v44, %v1072_v36  ;;  %v1161_v32 = vld [vmem:[#allocation2 + $0x18] sm:$0xff] }
 0x24b   : > { %1105 = vadd.xlane.f32.xlu0 %v1051_v26  ;;  %v1273_v0 = vpack.c.bf16 %v1052_v35, %v1051_v26 }
 0x24c   : > { %v2633_v62 = vpop.eup %2632 }
 0x24d   : > { %v2635_v1 = vpop.eup %2634  ;;  %v1060_v2 = vmul.f32 %v2633_v62, %v3326_v14  ;;  %2376 = vmatmul.mubr.bf16.gmra.mxu0 %v1273_v0  ;;  %v1070_v0 = vld [vmem:[#allocation4 + $0x48] sm:$0xff] }
 0x24e   : > { %v1057_v5 = vmul.f32 %v2635_v1, %v3326_v14  ;;  %v1086_v39 = vmul.f32 %v3304_v53, %v1070_v0 }
 0x24f   : > { %1123 = vadd.xlane.f32.xlu1 %v1060_v2  ;;  %1101 = vadd.xlane.f32.xlu0 %v1049_v11  ;;  %v3371_v11 = vpop.permute.xlu1 %1186 }
 0x250   : > { %v2637_v31 = vpop.eup %2636  ;;  %v1276_v6 = vpack.c.bf16 %v1058_v63, %v1057_v5 }
 0x251   : > { %v1059_v7 = vmul.f32 %v2637_v31, %v3326_v14  ;;  %v3359_v33 = vpop.eup %2638  ;;  %v3369_v14 = vpop.permute.xlu0 %1191  ;;  %v1076_v31 = vld [vmem:[#allocation4 + $0x78] sm:$0xff] }
 0x252   : > { %2383 = vmatprep.mubr.bf16.mxu1 %v1276_v6  ;;  %v2641_v54 = vpop.eup %2640 }
 0x253   : > { %v1277_v8 = vpack.c.bf16 %v1060_v2, %v1059_v7  ;;  %1119 = vadd.xlane.f32.xlu1 %v1058_v63  ;;  %1113 = vadd.xlane.f32.xlu0 %v1055_v46  ;;  %v3375_v20 = vpop.permute.xlu1 %1196  ;;  %v1067_v63 = vld [vmem:[#allocation4 + $0x30] sm:$0xff] }
 0x254   : > { %v1083_v51 = vmul.f32 %v3296_v52, %v1067_v63  ;;  %v1164_v63 = vld [vmem:[#allocation2 + $0x8] sm:$0xff] }
 0x255   : > { %2384 = vmatmul.mubr.bf16.gmra.mxu1 %v1277_v8  ;;  %v3373_v12 = vpop.permute.xlu0 %1211  ;;  %v1092_v8 = vmul.f32 %v2641_v54, %v1076_v31 }
 0x257   : > { %1109 = vadd.xlane.f32.xlu0 %v1053_v45  ;;  %v3379_v58 = vpop.permute.xlu1 %1206 }
 0x259   : > { %v3377_v21 = vpop.permute.xlu0 %1201 }
 0x25b   : > { %1121 = vadd.xlane.f32.xlu0 %v1059_v7  ;;  %v3383_v61 = vpop.permute.xlu1 %1226  ;;  %v1065_v7 = vld [vmem:[#allocation4 + $0x20] sm:$0xff] }
 0x25c   : > { %v1081_v44 = vmul.f32 %v3290_v47, %v1065_v7  ;;  %v1085_v47 = vmul.f32 %v3308_v55, %v1069_v24  ;;  %v1158_v55 = vld [vmem:[#allocation2 + $0x30] sm:$0xff]  ;;  %v1167_v7 = vld [vmem:[#allocation2 + $0x20] sm:$0xff] }
 0x25d   : > { %v3381_v4 = vpop.permute.xlu0 %1231 }
 0x25f   : > { %1117 = vadd.xlane.f32.xlu0 %v1057_v5  ;;  %v3387_v17 = vpop.permute.xlu1 %1216 }
 0x261   : > { %v3385_v22 = vpop.permute.xlu0 %1221 }
 0x263   : > { %v3392_v23 = vpop.permute.xlu1 %1236 }
 0x264   : > { %1246 = vperm.xlu1 %2560, %v3359_v33  }
 0x265   : > { %v3389_v35 = vpop.permute.xlu0 %1241 }
 0x275   : > { %1251 = vperm.xlu0 %2561, %v2641_v54  }
 0x2b0   : > { %v1098_v18 = vpop.xlane.xlu0 %1097 }
 0x2b1   : > { %v1127_v9 = vadd.f32 %v1098_v18, %v1079_v16  ;;  %v1071_v18 = vld [vmem:[#allocation4 + $0x50] sm:$0xff] }
 0x2b2   : > { %v1087_v52 = vmul.f32 %v3302_v50, %v1071_v18  ;;  %v1073_v50 = vld [vmem:[#allocation4 + $0x60] sm:$0xff] }
 0x2b3   : > { %1144 = vst.msk [vmem:[#allocation4 + $0x10] sm:$0xff] %vm1141_vm3, %v1127_v9  ;;  %v1090_v9 = vmul.f32 %v3310_v56, %v1074_v15 }
 0x2b4   : > { %v1094_v48 = vpop.xlane.xlu1 %1093 }
 0x2b5   : > { %v1125_v40 = vadd.f32 %v1094_v48, %v1077_v13 }
 0x2b7   : > { %1142 = vst.msk [vmem:[#allocation4] sm:$0xff] %vm1141_vm3, %v1125_v40 }
 0x2b8   : > { %v1096_v43 = vpop.xlane.xlu0 %1095  ;;  %v1100_v25 = vpop.xlane.xlu1 %1099 }
 0x2b9   : > { %v1126_v41 = vadd.f32 %v1096_v43, %v1078_v30  ;;  %v1128_v45 = vadd.f32 %v1100_v25, %v1080_v28  ;;  %v1075_v30 = vld [vmem:[#allocation4 + $0x70] sm:$0xff] }
 0x2ba   : > { %v1091_v56 = vmul.f32 %v3359_v33, %v1075_v30  ;;  %v1173_v30 = vld [vmem:[#allocation2 + $0x28] sm:$0xff] }
 0x2bb   : > { %1143 = vst.msk [vmem:[#allocation4 + $0x8] sm:$0xff] %vm1141_vm3, %v1126_v41  ;;  %1145 = vst.msk [vmem:[#allocation4 + $0x18] sm:$0xff] %vm1141_vm3, %v1128_v45  ;;  %v1089_v41 = vmul.f32 %v3314_v57, %v1073_v50 }
 0x2c4   : > { %v1108_v46 = vpop.xlane.xlu1 %1107 }
 0x2c5   : > { %v1132_v37 = vadd.f32 %v1108_v46, %v1084_v19  ;;  %v1160_v19 = vld [vmem:[#allocation2 + $0x58] sm:$0xff] }
 0x2c6   : > { %v1256_v46 = vmul.f32 %v3371_v11, %v1160_v19  ;;  %v1168_v11 = vld [vmem:[#allocation2 + $0x10] sm:$0xff] }
 0x2c7   : > { %1149 = vst.msk [vmem:[#allocation4 + $0x38] sm:$0xff] %vm1141_vm3, %v1132_v37 }
 0x2c8   : > { %v1104_v49 = vpop.xlane.xlu1 %1103 }
 0x2c9   : > { %v1130_v26 = vadd.f32 %v1104_v49, %v1082_v38  ;;  %v1254_v38 = vmul.f32 %v3365_v59, %v1158_v55  ;;  %v1159_v49 = vld [vmem:[#allocation2] sm:$0xff]  ;;  %v1264_v59 = vmul.f32 %v3383_v61, %v1168_v11 }
 0x2cb   : > { %1147 = vst.msk [vmem:[#allocation4 + $0x28] sm:$0xff] %vm1141_vm3, %v1130_v26  ;;  %v1257_v26 = vmul.f32 %v3369_v14, %v1161_v32 }
 0x2cc   : > { %v1116_v62 = vpop.xlane.xlu1 %1115 }
 0x2cd   : > { %v1136_v1 = vadd.f32 %v1116_v62, %v1088_v60  ;;  %v1255_v62 = vmul.f32 %v3367_v3, %v1159_v49 }
 0x2cf   : > { %1153 = vst.msk [vmem:[#allocation4 + $0x58] sm:$0xff] %vm1141_vm3, %v1136_v1 }
 0x2d0   : > { %v1112_v2 = vpop.xlane.xlu1 %1111 }
 0x2d1   : > { %v1134_v5 = vadd.f32 %v1112_v2, %v1086_v39  ;;  %v1166_v2 = vld [vmem:[#allocation2 + $0x40] sm:$0xff] }
 0x2d2   : > { %v1262_v14 = vmul.f32 %v3387_v17, %v1166_v2 }
 0x2d3   : > { %1151 = vst.msk [vmem:[#allocation4 + $0x48] sm:$0xff] %vm1141_vm3, %v1134_v5  ;;  %v1169_v5 = vld [vmem:[#allocation2 + $0x38] sm:$0xff] }
 0x2d4   : > { %v1106_v6 = vpop.xlane.xlu0 %1105  ;;  %v1265_v3 = vmul.f32 %v3381_v4, %v1169_v5  ;;  %v1172_v4 = vld [vmem:[#allocation2 + $0x78] sm:$0xff] }
 0x2d5   : > { %v1131_v29 = vadd.f32 %v1106_v6, %v1083_v51  ;;  %v1162_v6 = vld [vmem:[#allocation2 + $0x50] sm:$0xff] }
 0x2d6   : > { %v1258_v61 = vmul.f32 %v3375_v20, %v1162_v6  ;;  %v1170_v20 = vld [vmem:[#allocation2 + $0x60] sm:$0xff] }
 0x2d7   : > { %1148 = vst.msk [vmem:[#allocation4 + $0x30] sm:$0xff] %vm1141_vm3, %v1131_v29 }
 0x2d8   : > { %v1124_v10 = vpop.xlane.xlu1 %1123  ;;  %v1102_v16 = vpop.xlane.xlu0 %1101 }
 0x2d9   : > { %v1140_v53 = vadd.f32 %v1124_v10, %v1092_v8  ;;  %v1129_v27 = vadd.f32 %v1102_v16, %v1081_v44  ;;  %v1260_v8 = vmul.f32 %v3379_v58, %v1164_v63  ;;  %v1165_v10 = vld [vmem:[#allocation2 + $0x48] sm:$0xff] }
 0x2db   : > { %1157 = vst.msk [vmem:[#allocation4 + $0x78] sm:$0xff] %vm1141_vm3, %v1140_v53  ;;  %1146 = vst.msk [vmem:[#allocation4 + $0x20] sm:$0xff] %vm1141_vm3, %v1129_v27  ;;  %v1263_v53 = vmul.f32 %v3385_v22, %v1167_v7  ;;  %v1163_v27 = vld [vmem:[#allocation2 + $0x68] sm:$0xff] }
 0x2dc   : > { %v1120_v13 = vpop.xlane.xlu1 %1119  ;;  %v1114_v54 = vpop.xlane.xlu0 %1113 }
 0x2dd   : > { %v1138_v48 = vadd.f32 %v1120_v13, %v1090_v9  ;;  %v1135_v34 = vadd.f32 %v1114_v54, %v1087_v52  ;;  %v1261_v13 = vmul.f32 %v3373_v12, %v1165_v10 }
 0x2df   : > { %1155 = vst.msk [vmem:[#allocation4 + $0x68] sm:$0xff] %vm1141_vm3, %v1138_v48  ;;  %1152 = vst.msk [vmem:[#allocation4 + $0x50] sm:$0xff] %vm1141_vm3, %v1135_v34  ;;  %v1259_v34 = vmul.f32 %v3377_v21, %v1163_v27 }
 0x2e0   : > { %v1110_v40 = vpop.xlane.xlu0 %1109  ;;  %v1247_v54 = vpop.permute.xlu1 %1246 }
 0x2e1   : > { %v1133_v28 = vadd.f32 %v1110_v40, %v1085_v47  ;;  %v1268_v47 = vmul.f32 %v1247_v54, %v1172_v4 }
 0x2e3   : > { %1150 = vst.msk [vmem:[#allocation4 + $0x40] sm:$0xff] %vm1141_vm3, %v1133_v28 }
 0x2e4   : > { %v1122_v43 = vpop.xlane.xlu0 %1121 }
 0x2e5   : > { %v1139_v25 = vadd.f32 %v1122_v43, %v1091_v56  ;;  %v1266_v43 = vmul.f32 %v3392_v23, %v1170_v20 }
 0x2e7   : > { %1156 = vst.msk [vmem:[#allocation4 + $0x70] sm:$0xff] %vm1141_vm3, %v1139_v25  ;;  %v1171_v25 = vld [vmem:[#allocation2 + $0x70] sm:$0xff] }
 0x2e8   : > { %v1118_v45 = vpop.xlane.xlu0 %1117  ;;  %v1267_v19 = vmul.f32 %v3389_v35, %v1171_v25 }
 0x2e9   : > { %v1137_v42 = vadd.f32 %v1118_v45, %v1089_v41 }
 0x2eb   : > { %1154 = vst.msk [vmem:[#allocation4 + $0x60] sm:$0xff] %vm1141_vm3, %v1137_v42 }
 0x2f0   : > { %v1252_v28 = vpop.permute.xlu0 %1251 }
 0x2f1   : > { %v1269_v45 = vmul.f32 %v1252_v28, %v1173_v30 }
 0x2f2   : > { %v2373_v37 = vpop.f32.mrf.mxu0 }
 0x2f3   : > { %v1385_v33 = vadd.f32 %v2373_v37, %v1256_v46 }
 0x2f4   : > { %v1320_v36 = vpop.f32.mrf.mxu0 }
 0x2f5   : > { %1401 = vst [vmem:[#allocation2 + $0x58] sm:$0xff] %v1385_v33  ;;  %v1383_v60 = vadd.f32 %v1320_v36, %v1254_v38 }
 0x2f6   : > { %v2374_v57 = vpop.f32.mrf.mxu0 }
 0x2f7   : > { %1399 = vst [vmem:[#allocation2 + $0x30] sm:$0xff] %v1383_v60  ;;  %v1386_v0 = vadd.f32 %v2374_v57, %v1257_v26 }
 0x2f8   : > { %v1323_v1 = vpop.f32.mrf.mxu0 }
 0x2f9   : > { %1402 = vst [vmem:[#allocation2 + $0x18] sm:$0xff] %v1386_v0  ;;  %v1384_v39 = vadd.f32 %v1323_v1, %v1255_v62 }
 0x2fb   : > { %1400 = vst [vmem:[#allocation2] sm:$0xff] %v1384_v39 }
 0x30a   : > { %v2381_v51 = vpop.f32.mrf.mxu1 }
 0x30b   : > { %v1393_v31 = vadd.f32 %v2381_v51, %v1264_v59 }
 0x30c   : > { %v1352_v29 = vpop.f32.mrf.mxu1 }
 0x30d   : > { %1409 = vst [vmem:[#allocation2 + $0x10] sm:$0xff] %v1393_v31  ;;  %v1391_v44 = vadd.f32 %v1352_v29, %v1262_v14  ;;  %v2377_v15 = vpop.f32.mrf.mxu0 }
 0x30e   : > { %v2382_v16 = vpop.f32.mrf.mxu1  ;;  %v1389_v18 = vadd.f32 %v2377_v15, %v1260_v8 }
 0x30f   : > { %1407 = vst [vmem:[#allocation2 + $0x40] sm:$0xff] %v1391_v44  ;;  %v1394_v17 = vadd.f32 %v2382_v16, %v1265_v3  ;;  %v1336_v9 = vpop.f32.mrf.mxu0 }
 0x310   : > { %v1355_v52 = vpop.f32.mrf.mxu1  ;;  %1405 = vst [vmem:[#allocation2 + $0x8] sm:$0xff] %v1389_v18  ;;  %v1387_v58 = vadd.f32 %v1336_v9, %v1258_v61 }
 0x311   : > { %1410 = vst [vmem:[#allocation2 + $0x38] sm:$0xff] %v1394_v17  ;;  %v1392_v48 = vadd.f32 %v1355_v52, %v1263_v53  ;;  %v2378_v24 = vpop.f32.mrf.mxu0 }
 0x312   : > { %1403 = vst [vmem:[#allocation2 + $0x50] sm:$0xff] %v1387_v58  ;;  %v1390_v22 = vadd.f32 %v2378_v24, %v1261_v13 }
 0x313   : > { %1408 = vst [vmem:[#allocation2 + $0x20] sm:$0xff] %v1392_v48  ;;  %v1339_v40 = vpop.f32.mrf.mxu0 }
 0x314   : > { %1406 = vst [vmem:[#allocation2 + $0x48] sm:$0xff] %v1390_v22  ;;  %v1388_v56 = vadd.f32 %v1339_v40, %v1259_v34 }
 0x315   : > { %v2385_v12 = vpop.f32.mrf.mxu1 }
 0x316   : > { %v1397_v50 = vadd.f32 %v2385_v12, %v1268_v47  ;;  %1404 = vst [vmem:[#allocation2 + $0x68] sm:$0xff] %v1388_v56 }
 0x317   : > { %v1368_v41 = vpop.f32.mrf.mxu1 }
 0x318   : > { %1413 = vst [vmem:[#allocation2 + $0x78] sm:$0xff] %v1397_v50  ;;  %v1395_v21 = vadd.f32 %v1368_v41, %v1266_v43 }
 0x319   : > { %v2386_v42 = vpop.f32.mrf.mxu1 }
 0x31a   : > { %1411 = vst [vmem:[#allocation2 + $0x60] sm:$0xff] %v1395_v21  ;;  %v1398_v55 = vadd.f32 %v2386_v42, %v1269_v45 }
 0x31b   : > { %v1371_v46 = vpop.f32.mrf.mxu1 }
 0x31c   : > { %1414 = vst [vmem:[#allocation2 + $0x28] sm:$0xff] %v1398_v55  ;;  %v1396_v32 = vadd.f32 %v1371_v46, %v1267_v19 }
 0x31e   : > { %1412 = vst [vmem:[#allocation2 + $0x70] sm:$0xff] %v1396_v32 }
 0x31f PF: > { %p2235_p3 = scmp.ne.s32.totalorder %s2815_s13, 1 }
 0x320   : > { %p2236_p4 = scmp.ne.s32.totalorder (!%p2235_p3), %s2811_s12, 0 }
 0x321   : > { %1434 = sbr.rel (%p2235_p3) target bundleno = 1789 (0x6fd), region = 68 }
 0x326   : > { %v3440_v23 = vld [vmem:[%s3003_s11] sm:$0xf]  ;;  %1439 = sbr.rel (%p2236_p4) target bundleno = 1222 (0x4c6), region = 72 }
 0x32b   : > { %v1470_v37 = vld [vmem:[#allocation4 + $0x70] sm:$0xff]  ;;  %v1468_v38 = vld [vmem:[#allocation4 + $0x60] sm:$0xff]  ;;  %v1471_v33 = vld [vmem:[#allocation4 + $0x78] sm:$0xff]  ;;  %v2840_v35 = vmov 0   ;;  %v2841_v6 = vmov 0.0   ;;  %vm2842_vm4 = vmmov 0  }
 0x32c   : > { %2643 = vset.pattern.permute.xlu1 %v2840_v35  ;;  %2642 = vset.pattern.permute.xlu0 %v2840_v35  ;;  %2644 = vrcp.f32 %v1470_v37  ;;  %v1469_v49 = vld [vmem:[#allocation4 + $0x68] sm:$0xff]  ;;  %v1466_v36 = vld [vmem:[#allocation4 + $0x50] sm:$0xff]  ;;  %v1467_v26 = vld [vmem:[#allocation4 + $0x58] sm:$0xff] }
 0x32d   : > { %2646 = vrcp.f32 %v1468_v38  ;;  %v1464_v60 = vld [vmem:[#allocation4 + $0x40] sm:$0xff]  ;;  %v1465_v57 = vld [vmem:[#allocation4 + $0x48] sm:$0xff]  ;;  %v1462_v62 = vld [vmem:[#allocation4 + $0x30] sm:$0xff]  ;;  %2387 = vmatprep.subr.bf16.mxu0 %v2841_v6  ;;  %2403 = vmatprep.mubr.msk.bf16.mxu0 %vm2842_vm4, %v2841_v6 }
 0x32e   : > { %2648 = vrcp.f32 %v1471_v33  ;;  %v1463_v0 = vld [vmem:[#allocation4 + $0x38] sm:$0xff]  ;;  %v1460_v2 = vld [vmem:[#allocation4 + $0x20] sm:$0xff]  ;;  %v1461_v5 = vld [vmem:[#allocation4 + $0x28] sm:$0xff] }
 0x32f   : > { %2650 = vrcp.f32 %v1469_v49  ;;  %v1458_v51 = vld [vmem:[#allocation4 + $0x10] sm:$0xff]  ;;  %v1459_v31 = vld [vmem:[#allocation4 + $0x18] sm:$0xff]  ;;  %v1456_v29 = vld [vmem:[#allocation4] sm:$0xff] }
 0x330   : > { %2652 = vrcp.f32 %v1466_v36  ;;  %v1457_v8 = vld [vmem:[#allocation4 + $0x8] sm:$0xff]  ;;  %v1454_v9 = vld [vmem:[#allocation2 + $0x78] sm:$0xff]  ;;  %v1614_v54 = vld [vmem:[%s3685_s7 + $0x70] sm:$0xff] }
 0x331   : > { %2654 = vrcp.f32 %v1467_v26  ;;  %v1455_v13 = vld [vmem:[#allocation2 + $0x28] sm:$0xff]  ;;  %v1615_v58 = vld [vmem:[%s3685_s7 + $0x78] sm:$0xff]  ;;  %v1452_v34 = vld [vmem:[#allocation2 + $0x60] sm:$0xff] }
 0x332   : > { %2656 = vrcp.f32 %v1464_v60  ;;  %v1453_v20 = vld [vmem:[#allocation2 + $0x70] sm:$0xff]  ;;  %v1612_v12 = vld [vmem:[%s3685_s7 + $0x60] sm:$0xff]  ;;  %v1613_v43 = vld [vmem:[%s3685_s7 + $0x68] sm:$0xff] }
 0x333   : > { %2658 = vrcp.f32 %v1465_v57  ;;  %v1451_v45 = vld [vmem:[#allocation2 + $0x38] sm:$0xff]  ;;  %v1450_v42 = vld [vmem:[#allocation2 + $0x10] sm:$0xff]  ;;  %v1449_v49 = vld [vmem:[#allocation2 + $0x20] sm:$0xff] }
 0x334   : > { %2660 = vrcp.f32 %v1462_v62  ;;  %v1611_v32 = vld [vmem:[%s3685_s7 + $0x58] sm:$0xff]  ;;  %v1610_v37 = vld [vmem:[%s3685_s7 + $0x50] sm:$0xff]  ;;  %v1448_v26 = vld [vmem:[#allocation2 + $0x40] sm:$0xff] }
 0x335   : > { %2662 = vrcp.f32 %v1463_v0  ;;  %v1609_v0 = vld [vmem:[%s3685_s7 + $0x48] sm:$0xff] }
 0x336   : > { %2664 = vrcp.f32 %v1460_v2 }
 0x337   : > { %2666 = vrcp.f32 %v1461_v5 }
 0x338   : > { %2668 = vrcp.f32 %v1458_v51 }
 0x339   : > { %v2645_v1 = vpop.eup %2644  ;;  %2670 = vrcp.f32 %v1459_v31 }
 0x33a   : > { %v2647_v39 = vpop.eup %2646  ;;  %1576 = vperm.xlu0 %2642, %v2645_v1   ;;  %2672 = vrcp.f32 %v1456_v29  ;;  %v1608_v1 = vld [vmem:[%s3685_s7 + $0x40] sm:$0xff]  ;;  %v1606_v29 = vld [vmem:[%s3685_s7 + $0x30] sm:$0xff] }
 0x33b   : > { %v2649_v11 = vpop.eup %2648  ;;  %1566 = vperm.xlu1 %2643, %v2647_v39   ;;  %2674 = vrcp.f32 %v1457_v8 }
 0x33c   : > { %v2651_v59 = vpop.eup %2650 }
 0x33d   : > { %v2653_v63 = vpop.eup %2652 }
 0x33e   : > { %1581 = vperm.xlu0 %2642, %v2649_v11   ;;  %v2655_v14 = vpop.eup %2654 }
 0x33f   : > { %1571 = vperm.xlu1 %2643, %v2651_v59   ;;  %v2657_v7 = vpop.eup %2656  ;;  %v1447_v59 = vld [vmem:[#allocation2 + $0x48] sm:$0xff] }
 0x340   : > { %v2659_v3 = vpop.eup %2658 }
 0x341   : > { %v2661_v44 = vpop.eup %2660 }
 0x342   : > { %1556 = vperm.xlu0 %2642, %v2653_v63   ;;  %v2663_v10 = vpop.eup %2662  ;;  %v1446_v63 = vld [vmem:[#allocation2 + $0x8] sm:$0xff] }
 0x343   : > { %1561 = vperm.xlu1 %2643, %v2655_v14   ;;  %v2665_v15 = vpop.eup %2664 }
 0x344   : > { %v2667_v16 = vpop.eup %2666 }
 0x345   : > { %v2669_v61 = vpop.eup %2668 }
 0x346   : > { %1546 = vperm.xlu0 %2642, %v2657_v7   ;;  %v2671_v53 = vpop.eup %2670  ;;  %v1607_v7 = vld [vmem:[%s3685_s7 + $0x38] sm:$0xff] }
 0x347   : > { %1551 = vperm.xlu1 %2643, %v2659_v3   ;;  %v2673_v18 = vpop.eup %2672 }
 0x348   : > { %v2675_v17 = vpop.eup %2674 }
 0x34a   : > { %1536 = vperm.xlu0 %2642, %v2661_v44  }
 0x34b   : > { %1541 = vperm.xlu1 %2643, %v2663_v10   ;;  %v1445_v10 = vld [vmem:[#allocation2 + $0x68] sm:$0xff] }
 0x34e   : > { %1526 = vperm.xlu0 %2642, %v2665_v15  }
 0x34f   : > { %1531 = vperm.xlu1 %2643, %v2667_v16   ;;  %v1444_v16 = vld [vmem:[#allocation2 + $0x50] sm:$0xff] }
 0x352   : > { %1516 = vperm.xlu0 %2642, %v2669_v61  }
 0x353   : > { %1521 = vperm.xlu1 %2643, %v2671_v53  }
 0x356   : > { %1506 = vperm.xlu0 %2642, %v2673_v18  }
 0x357   : > { %1511 = vperm.xlu1 %2643, %v2675_v17   ;;  %v1605_v17 = vld [vmem:[%s3685_s7 + $0x28] sm:$0xff] }
 0x3b5   : > { %v1577_v27 = vpop.permute.xlu0 %1576 }
 0x3b6   : > { %v1567_v52 = vpop.permute.xlu1 %1566  ;;  %v1598_v4 = vmul.f32 %v1577_v27, %v1454_v9  ;;  %v1604_v27 = vld [vmem:[%s3685_s7 + $0x20] sm:$0xff] }
 0x3b7   : > { %v1596_v30 = vmul.f32 %v1567_v52, %v1452_v34 }
 0x3b8   : > { %v1630_v22 = vmul.f32 %v1614_v54, %v1598_v4  ;;  %v1443_v4 = vld [vmem:[#allocation2 + $0x18] sm:$0xff] }
 0x3b9   : > { %v1582_v48 = vpop.permute.xlu0 %1581  ;;  %v1628_v50 = vmul.f32 %v1612_v12, %v1596_v30  ;;  %v1440_v12 = vld [vmem:[#allocation2 + $0x30] sm:$0xff] }
 0x3ba   : > { %v1599_v24 = vmul.f32 %v1582_v48, %v1455_v13  ;;  %v1572_v40 = vpop.permute.xlu1 %1571 }
 0x3bb   : > { %v1597_v28 = vmul.f32 %v1572_v40, %v1453_v20  ;;  %v1603_v20 = vld [vmem:[%s3685_s7 + $0x18] sm:$0xff] }
 0x3bc   : > { %v1631_v47 = vmul.f32 %v1615_v58, %v1599_v24  ;;  %v1442_v58 = vld [vmem:[#allocation2 + $0x58] sm:$0xff] }
 0x3bd   : > { %v1629_v25 = vmul.f32 %v1613_v43, %v1597_v28  ;;  %v1557_v21 = vpop.permute.xlu0 %1556  ;;  %v1441_v28 = vld [vmem:[#allocation2] sm:$0xff] }
 0x3be   : > { %v1640_v56 = vpack.c.bf16 %v1631_v47, %v1630_v22  ;;  %v1562_v41 = vpop.permute.xlu1 %1561  ;;  %v1594_v55 = vmul.f32 %v1557_v21, %v1450_v42  ;;  %v1602_v22 = vld [vmem:[%s3685_s7 + $0x10] sm:$0xff] }
 0x3bf   : > { %v1595_v19 = vmul.f32 %v1562_v41, %v1451_v45  ;;  %v1639_v46 = vpack.c.bf16 %v1629_v25, %v1628_v50  ;;  %v1601_v41 = vld [vmem:[%s3685_s7 + $0x8] sm:$0xff]  ;;  %v1600_v45 = vld [vmem:[%s3685_s7] sm:$0xff] }
 0x3c0   : > { %2388 = vmatpush3.bf16.xpose.msra.mxu0 %v1640_v56  ;;  %v1626_v33 = vmul.f32 %v1610_v37, %v1594_v55  ;;  %v1632_v55 = vld [vmem:[%s3682_s4] sm:$0xf] }
 0x3c1   : > { %2389 = vmatprep.subr.bf16.mxu0 %v2841_v6  ;;  %v1627_v38 = vmul.f32 %v1611_v32, %v1595_v19  ;;  %v1547_v36 = vpop.permute.xlu0 %1546 }
 0x3c2   : > { %v1552_v35 = vpop.permute.xlu1 %1551  ;;  %v1592_v57 = vmul.f32 %v1547_v36, %v1448_v26 }
 0x3c3   : > { %v1593_v60 = vmul.f32 %v1552_v35, %v1449_v49  ;;  %v1638_v62 = vpack.c.bf16 %v1627_v38, %v1626_v33 }
 0x3c4   : > { %v1624_v11 = vmul.f32 %v1608_v1, %v1592_v57 }
 0x3c5   : > { %v1625_v39 = vmul.f32 %v1609_v0, %v1593_v60  ;;  %v1537_v5 = vpop.permute.xlu0 %1536 }
 0x3c6   : > { %v1542_v2 = vpop.permute.xlu1 %1541  ;;  %v1590_v14 = vmul.f32 %v1537_v5, %v1446_v63 }
 0x3c7   : > { %v1591_v51 = vmul.f32 %v1542_v2, %v1447_v59  ;;  %v1637_v31 = vpack.c.bf16 %v1625_v39, %v1624_v11 }
 0x3c8   : > { %2390 = vmatpush3.bf16.xpose.msra.mxu0 %v1639_v46  ;;  %v1622_v8 = vmul.f32 %v1606_v29, %v1590_v14 }
 0x3c9   : > { %2391 = vmatprep.subr.bf16.mxu0 %v2841_v6  ;;  %v1623_v3 = vmul.f32 %v1607_v7, %v1591_v51  ;;  %v1527_v15 = vpop.permute.xlu0 %1526 }
 0x3ca   : > { %v1532_v44 = vpop.permute.xlu1 %1531  ;;  %v1588_v53 = vmul.f32 %v1527_v15, %v1444_v16 }
 0x3cb   : > { %v1589_v61 = vmul.f32 %v1532_v44, %v1445_v10  ;;  %v1636_v18 = vpack.c.bf16 %v1623_v3, %v1622_v8 }
 0x3cc   : > { %v1620_v52 = vmul.f32 %v1604_v27, %v1588_v53 }
 0x3cd   : > { %v1621_v9 = vmul.f32 %v1605_v17, %v1589_v61  ;;  %v1517_v54 = vpop.permute.xlu0 %1516 }
 0x3ce   : > { %v1522_v13 = vpop.permute.xlu1 %1521  ;;  %v1586_v24 = vmul.f32 %v1517_v54, %v1442_v58 }
 0x3cf   : > { %v1587_v48 = vmul.f32 %v1522_v13, %v1443_v4  ;;  %v1635_v34 = vpack.c.bf16 %v1621_v9, %v1620_v52 }
 0x3d0   : > { %2392 = vmatpush3.bf16.xpose.msra.mxu0 %v1638_v62  ;;  %v1618_v40 = vmul.f32 %v1602_v22, %v1586_v24 }
 0x3d1   : > { %2393 = vmatprep.subr.bf16.mxu0 %v2841_v6  ;;  %v1619_v47 = vmul.f32 %v1603_v20, %v1587_v48  ;;  %v1507_v56 = vpop.permute.xlu0 %1506 }
 0x3d2   : > { %v1512_v30 = vpop.permute.xlu1 %1511  ;;  %v1584_v50 = vmul.f32 %v1507_v56, %v1440_v12 }
 0x3d3   : > { %v1585_v43 = vmul.f32 %v1512_v30, %v1441_v28  ;;  %v1634_v25 = vpack.c.bf16 %v1619_v47, %v1618_v40 }
 0x3d4   : > { %v1616_v42 = vmul.f32 %v1600_v45, %v1584_v50 }
 0x3d5   : > { %v1617_v21 = vmul.f32 %v1601_v41, %v1585_v43 }
 0x3d7   : > { %v1633_v19 = vpack.c.bf16 %v1617_v21, %v1616_v42 }
 0x3d8   : > { %2394 = vmatpush3.bf16.xpose.msra.mxu0 %v1637_v31 }
 0x3d9   : > { %2395 = vmatprep.subr.bf16.mxu0 %v2841_v6 }
 0x3e0   : > { %2396 = vmatpush3.bf16.xpose.msra.mxu0 %v1636_v18 }
 0x3e1   : > { %2397 = vmatprep.subr.bf16.mxu0 %v2841_v6 }
 0x3e8   : > { %2398 = vmatpush3.bf16.xpose.msra.mxu0 %v1635_v34 }
 0x3e9   : > { %2399 = vmatprep.subr.bf16.mxu0 %v2841_v6 }
 0x3f0   : > { %2400 = vmatpush3.bf16.xpose.msra.mxu0 %v1634_v25 }
 0x3f1   : > { %2401 = vmatprep.subr.bf16.mxu0 %v2841_v6 }
 0x3f8   : > { %2402 = vmatpush3.bf16.xpose.msra.mxu0 %v1633_v19 }
 0x3ff   : > { %2404 = vmatmul.mubr.bf16.vlgmr.msra.gmra.mxu0 %v1632_v55 }
 0x4bf   : > { %v1675_v46 = vpop.f32.mrf.mxu0 }
 0x4c0   : > { %v1681_v32 = vpack.c.bf16 %v1675_v46, %v1675_v46 }
 0x4c1   : > { %v2405_v37 = vpop.f32.mrf.mxu0 }
 0x4c2   : > { %1682 = vst [vmem:[#allocation5] sm:$0xf] %v1681_v32 }
 0x4c3   : > { %v1678_v38 = vpop.f32.mrf.mxu0 }
 0x4c5   : > { %v2406_v33 = vpop.f32.mrf.mxu0 }
 0x4c6 PF: > { %vm1764_vm5 = vcmask 1043456   ;;  %s3710_s1 = sld [smem:[#allocation18_spill]]  ;;  %vm1739_vm6 = vcmask 64512   ;;  %v2843_v0 = vmov 0.0   ;;  %vm2844_vm7 = vmmov 0   ;;  %v2018_v14 = vld [vmem:[%s3683_s5] sm:$0xff] }
 0x4c7   : > { %2463 = vmatprep.subr.msk.bf16.mxu0 %vm1764_vm5, %v3440_v23  ;;  %v1766_v35 = vsel %vm1764_vm5, %v3440_v23, 0  ;;  %2425 = vmatprep.subr.bf16.mxu1 %v2843_v0  ;;  %v2845_v7 = vmov 0   ;;  %v2074_v8 = vld [vmem:[%s3684_s6] sm:$0xff]  ;;  %s3711_s15 = scalar_lea.vmem [#allocation6], %s2988_s24 }
 0x4c8   : > { %2408 = vmatpush3.bf16.msra.mxu0 %v1766_v35  ;;  %2441 = vmatprep.mubr.msk.bf16.mxu1 %vm2844_vm7, %v2843_v0 }
 0x4c9   : > { %2676 = vset.pattern.permute.xlu0 %v2845_v7 }
 0x4ca   : > { %2021 = vperm.xlu0 %2676, %v2018_v14  }
 0x4cc   : > { %v2677_v6 = vld [vmem:[%s3710_s1] sm:$0xff]   ;;  %v2678_v49 = vld [vmem:[%s3710_s1 + $0x8] sm:$0xff]   ;;  %v2679_v36 = vld [vmem:[%s3710_s1 + $0x10] sm:$0xff]  }
 0x4cd   : > { %2409 = vmatprep.mubr.msk.bf16.mxu0 %vm1739_vm6, %v2677_v6  ;;  %v2680_v23 = vld [vmem:[%s3710_s1 + $0x18] sm:$0xff]   ;;  %v2681_v26 = vld [vmem:[%s3710_s1 + $0x20] sm:$0xff]   ;;  %v2682_v60 = vld [vmem:[%s3710_s1 + $0x28] sm:$0xff]  }
 0x4ce   : > { %2410 = vmatmul.mubr.msk.bf16.vlgmr.msra.gmra.mxu0 %vm1739_vm6, %v2678_v49  ;;  %v2683_v57 = vld [vmem:[%s3710_s1 + $0x30] sm:$0xff]   ;;  %v2684_v62 = vld [vmem:[%s3710_s1 + $0x38] sm:$0xff]   ;;  %2077 = vperm.xlu0 %2676, %v2074_v8  }
 0x4cf   : > { %2413 = vmatprep.mubr.msk.bf16.mxu0 %vm1739_vm6, %v2679_v36 }
 0x4d6   : > { %2414 = vmatmul.mubr.msk.bf16.gmra.mxu0 %vm1739_vm6, %v2680_v23 }
 0x4d7   : > { %2417 = vmatprep.mubr.msk.bf16.mxu0 %vm1739_vm6, %v2681_v26 }
 0x4de   : > { %2418 = vmatmul.mubr.msk.bf16.gmra.mxu0 %vm1739_vm6, %v2682_v60 }
 0x4df   : > { %2421 = vmatprep.mubr.msk.bf16.mxu0 %vm1739_vm6, %v2683_v57 }
 0x4e6   : > { %2422 = vmatmul.mubr.msk.bf16.gmra.mxu0 %vm1739_vm6, %v2684_v62 }
 0x58e   : > { %v2411_v1 = vpop.f32.mrf.mxu0 }
 0x590   : > { %v1802_v39 = vpop.f32.mrf.mxu0 }
 0x592   : > { %v2412_v11 = vpop.f32.mrf.mxu0 }
 0x594   : > { %v1805_v2 = vpop.f32.mrf.mxu0 }
 0x595   : > { %v1865_v59 = vmax.f32 %v1802_v39, %v1805_v2 }
 0x596   : > { %v3538_v5 = vpop.f32.mrf.mxu0 }
 0x597   : > { %v1866_v63 = vmax.f32 %v1865_v59, %v2411_v1 }
 0x598   : > { %v1818_v51 = vpop.f32.mrf.mxu0 }
 0x599   : > { %v1867_v31 = vmax.f32 %v1866_v63, %v2412_v11 }
 0x59a   : > { %v3544_v29 = vpop.f32.mrf.mxu0 }
 0x59b   : > { %v1868_v3 = vrot.slane %v1867_v31, 4 }
 0x59c   : > { %v1821_v44 = vpop.f32.mrf.mxu0 }
 0x59d   : > { %v1869_v10 = vmax.f32 %v1867_v31, %v1868_v3  ;;  %v1874_v15 = vmax.f32 %v1818_v51, %v1821_v44 }
 0x59e   : > { %v3549_v16 = vpop.f32.mrf.mxu0 }
 0x59f   : > { %v1870_v61 = vrot.slane %v1869_v10, 2  ;;  %v1875_v53 = vmax.f32 %v1874_v15, %v3538_v5 }
 0x5a0   : > { %v1834_v18 = vpop.f32.mrf.mxu0 }
 0x5a1   : > { %v1871_v17 = vmax.f32 %v1869_v10, %v1870_v61  ;;  %v1876_v27 = vmax.f32 %v1875_v53, %v3544_v29 }
 0x5a2   : > { %v3553_v9 = vpop.f32.mrf.mxu0 }
 0x5a3   : > { %v1872_v52 = vrot.slane %v1871_v17, 1  ;;  %v1877_v13 = vrot.slane %v1876_v27, 4 }
 0x5a4   : > { %v1837_v4 = vpop.f32.mrf.mxu0 }
 0x5a5   : > { %v1873_v54 = vmax.f32 %v1871_v17, %v1872_v52  ;;  %v1878_v58 = vmax.f32 %v1876_v27, %v1877_v13  ;;  %v1883_v48 = vmax.f32 %v1834_v18, %v1837_v4 }
 0x5a6   : > { %v3555_v24 = vpop.f32.mrf.mxu0 }
 0x5a7   : > { %v1901_v34 = vsub.f32 %v1802_v39, %v1873_v54  ;;  %v1902_v20 = vsub.f32 %v1805_v2, %v1873_v54  ;;  %v1903_v22 = vsub.f32 %v2411_v1, %v1873_v54  ;;  %v1904_v47 = vsub.f32 %v2412_v11, %v1873_v54 }
 0x5a8   : > { %v1879_v40 = vrot.slane %v1878_v58, 2  ;;  %v1884_v30 = vmax.f32 %v1883_v48, %v3549_v16  ;;  %v3558_v28 = vpop.f32.mrf.mxu0 }
 0x5a9   : > { %v1917_v56 = vmul.f32 1.442695, %v1901_v34  ;;  %v1919_v12 = vmul.f32 1.442695, %v1902_v20  ;;  %v1921_v43 = vmul.f32 1.442695, %v1903_v22 }
 0x5aa   : > { %v1880_v50 = vmax.f32 %v1878_v58, %v1879_v40  ;;  %v1885_v25 = vmax.f32 %v1884_v30, %v3553_v9  ;;  %v3561_v41 = vpop.f32.mrf.mxu0  ;;  %v1923_v45 = vmul.f32 1.442695, %v1904_v47 }
 0x5ab   : > { %2685 = vpow2.f32 %v1917_v56 }
 0x5ac   : > { %2687 = vpow2.f32 %v1919_v12  ;;  %v1881_v21 = vrot.slane %v1880_v50, 1  ;;  %v1886_v42 = vrot.slane %v1885_v25, 4  ;;  %v1853_v19 = vpop.f32.mrf.mxu0 }
 0x5ad   : > { %v1892_v55 = vmax.f32 %v3558_v28, %v1853_v19  ;;  %2689 = vpow2.f32 %v1921_v43 }
 0x5ae   : > { %v1882_v46 = vmax.f32 %v1880_v50, %v1881_v21  ;;  %v1887_v32 = vmax.f32 %v1885_v25, %v1886_v42  ;;  %2691 = vpow2.f32 %v1923_v45 }
 0x5af   : > { %v1893_v37 = vmax.f32 %v1892_v55, %v3555_v24 }
 0x5b0   : > { %v1888_v38 = vrot.slane %v1887_v32, 2  ;;  %v1905_v6 = vsub.f32 %v1818_v51, %v1882_v46  ;;  %v1906_v35 = vsub.f32 %v1821_v44, %v1882_v46  ;;  %v1907_v2 = vsub.f32 %v3538_v5, %v1882_v46 }
 0x5b1   : > { %v1894_v33 = vmax.f32 %v1893_v37, %v3561_v41  ;;  %v1908_v8 = vsub.f32 %v3544_v29, %v1882_v46 }
 0x5b2   : > { %v1889_v49 = vmax.f32 %v1887_v32, %v1888_v38  ;;  %v1925_v60 = vmul.f32 1.442695, %v1905_v6  ;;  %v1927_v57 = vmul.f32 1.442695, %v1906_v35 }
 0x5b3   : > { %v1895_v36 = vrot.slane %v1894_v33, 4 }
 0x5b4   : > { %v1890_v23 = vrot.slane %v1889_v49, 1  ;;  %2693 = vpow2.f32 %v1925_v60 }
 0x5b5   : > { %v1896_v26 = vmax.f32 %v1894_v33, %v1895_v36  ;;  %2695 = vpow2.f32 %v1927_v57 }
 0x5b6   : > { %v1891_v62 = vmax.f32 %v1889_v49, %v1890_v23 }
 0x5b7   : > { %v1897_v1 = vrot.slane %v1896_v26, 2 }
 0x5b8   : > { %v3566_v39 = vpop.eup %2685  ;;  %v1909_v59 = vsub.f32 %v1834_v18, %v1891_v62  ;;  %v1910_v63 = vsub.f32 %v1837_v4, %v1891_v62  ;;  %v1911_v14 = vsub.f32 %v3549_v16, %v1891_v62  ;;  %v1912_v31 = vsub.f32 %v3553_v9, %v1891_v62 }
 0x5b9   : > { %v3568_v11 = vpop.eup %2687  ;;  %v1898_v7 = vmax.f32 %v1896_v26, %v1897_v1  ;;  %v1929_v16 = vmul.f32 1.442695, %v1907_v2  ;;  %v1931_v9 = vmul.f32 1.442695, %v1908_v8 }
 0x5ba   : > { %v1949_v51 = vadd.f32 %v3568_v11, %v3566_v39  ;;  %v3575_v3 = vpop.eup %2689  ;;  %v1933_v44 = vmul.f32 1.442695, %v1909_v59  ;;  %v1935_v10 = vmul.f32 1.442695, %v1910_v63  ;;  %v1937_v15 = vmul.f32 1.442695, %v1911_v14 }
 0x5bb   : > { %v1899_v61 = vrot.slane %v1898_v7, 1  ;;  %v3579_v53 = vpop.eup %2691  ;;  %v1939_v17 = vmul.f32 1.442695, %v1912_v31 }
 0x5bc   : > { %v1950_v5 = vadd.f32 %v3575_v3, %v1949_v51  ;;  %2697 = vpow2.f32 %v1933_v44 }
 0x5bd   : > { %2699 = vpow2.f32 %v1935_v10  ;;  %v1900_v27 = vmax.f32 %v1898_v7, %v1899_v61 }
 0x5be   : > { %v1951_v18 = vadd.f32 %v3579_v53, %v1950_v5  ;;  %2701 = vpow2.f32 %v1937_v15 }
 0x5bf   : > { %v1913_v29 = vsub.f32 %v3558_v28, %v1900_v27  ;;  %v1914_v13 = vsub.f32 %v1853_v19, %v1900_v27  ;;  %2703 = vpow2.f32 %v1929_v16  ;;  %v1915_v4 = vsub.f32 %v3555_v24, %v1900_v27 }
 0x5c0   : > { %v1952_v52 = vrot.slane %v1951_v18, 4  ;;  %v1916_v54 = vsub.f32 %v3561_v41, %v1900_v27  ;;  %2705 = vpow2.f32 %v1939_v17 }
 0x5c1   : > { %v1941_v58 = vmul.f32 1.442695, %v1913_v29  ;;  %v1943_v48 = vmul.f32 1.442695, %v1914_v13  ;;  %2707 = vpow2.f32 %v1931_v9  ;;  %v1945_v20 = vmul.f32 1.442695, %v1915_v4  ;;  %v3585_v30 = vpop.eup %2693 }
 0x5c2   : > { %v1953_v34 = vadd.f32 %v1952_v52, %v1951_v18  ;;  %v1947_v47 = vmul.f32 1.442695, %v1916_v54  ;;  %v3587_v28 = vpop.eup %2695 }
 0x5c3   : > { %2709 = vpow2.f32 %v1941_v58  ;;  %v1958_v50 = vadd.f32 %v3587_v28, %v3585_v30 }
 0x5c4   : > { %v1954_v22 = vrot.slane %v1953_v34, 2  ;;  %2711 = vpow2.f32 %v1943_v48 }
 0x5c5   : > { %2713 = vpow2.f32 %v1945_v20 }
 0x5c6   : > { %v1955_v40 = vadd.f32 %v1954_v22, %v1953_v34  ;;  %2715 = vpow2.f32 %v1947_v47 }
 0x5c8   : > { %v1956_v56 = vrot.slane %v1955_v40, 1 }
 0x5c9   : > { %v3589_v24 = vpop.eup %2697 }
 0x5ca   : > { %v1957_v12 = vadd.f32 %v1956_v56, %v1955_v40  ;;  %v3591_v43 = vpop.eup %2699 }
 0x5cb   : > { %v1967_v25 = vadd.f32 %v3591_v43, %v3589_v24  ;;  %v2702_v41 = vpop.eup %2701 }
 0x5cc   : > { %2717 = vrcp.f32 %v1957_v12  ;;  %v3597_v45 = vpop.eup %2703 }
 0x5cd   : > { %v1968_v21 = vadd.f32 %v2702_v41, %v1967_v25  ;;  %v2706_v42 = vpop.eup %2705  ;;  %v1959_v19 = vadd.f32 %v3597_v45, %v1958_v50 }
 0x5ce   : > { %v3600_v55 = vpop.eup %2707 }
 0x5cf   : > { %v1969_v46 = vadd.f32 %v2706_v42, %v1968_v21  ;;  %v1960_v33 = vadd.f32 %v3600_v55, %v1959_v19 }
 0x5d0   : > { %v2710_v32 = vpop.eup %2709 }
 0x5d1   : > { %v2712_v37 = vpop.eup %2711  ;;  %v1970_v38 = vrot.slane %v1969_v46, 4  ;;  %v1961_v26 = vrot.slane %v1960_v33, 4 }
 0x5d2   : > { %v1976_v6 = vadd.f32 %v2712_v37, %v2710_v32  ;;  %v2714_v35 = vpop.eup %2713 }
 0x5d3   : > { %v1971_v49 = vadd.f32 %v1970_v38, %v1969_v46  ;;  %v2716_v23 = vpop.eup %2715  ;;  %v1962_v14 = vadd.f32 %v1961_v26, %v1960_v33 }
 0x5d4   : > { %v1977_v36 = vadd.f32 %v2714_v35, %v1976_v6 }
 0x5d5   : > { %v1972_v57 = vrot.slane %v1971_v49, 2  ;;  %v1963_v61 = vrot.slane %v1962_v14, 2 }
 0x5d6   : > { %v1978_v60 = vadd.f32 %v2716_v23, %v1977_v36 }
 0x5d7   : > { %v1973_v63 = vadd.f32 %v1972_v57, %v1971_v49  ;;  %v1964_v9 = vadd.f32 %v1963_v61, %v1962_v14 }
 0x5d8   : > { %v1979_v1 = vrot.slane %v1978_v60, 4 }
 0x5d9   : > { %v2718_v62 = vpop.eup %2717  ;;  %v1974_v15 = vrot.slane %v1973_v63, 1  ;;  %v1965_v52 = vrot.slane %v1964_v9, 1 }
 0x5da   : > { %v1989_v2 = vmul.f32 0.17677669, %v2718_v62  ;;  %v1980_v59 = vadd.f32 %v1979_v1, %v1978_v60 }
 0x5db   : > { %v1975_v27 = vadd.f32 %v1974_v15, %v1973_v63 }
 0x5dc   : > { %v1995_v51 = vmul.f32 %v3575_v3, %v1989_v2  ;;  %v1996_v31 = vmul.f32 %v3579_v53, %v1989_v2  ;;  %v1993_v7 = vmul.f32 %v3566_v39, %v1989_v2  ;;  %v1981_v8 = vrot.slane %v1980_v59, 2 }
 0x5dd   : > { %v1994_v44 = vmul.f32 %v3568_v11, %v1989_v2  ;;  %v1966_v3 = vadd.f32 %v1965_v52, %v1964_v9 }
 0x5de   : > { %v2010_v10 = vpack.c.bf16 %v1996_v31, %v1995_v51  ;;  %v1982_v5 = vadd.f32 %v1981_v8, %v1980_v59 }
 0x5df   : > { %v2009_v16 = vpack.c.bf16 %v1994_v44, %v1993_v7 }
 0x5e0   : > { %v1983_v18 = vrot.slane %v1982_v5, 1 }
 0x5e2   : > { %v1984_v17 = vadd.f32 %v1983_v18, %v1982_v5 }
 0x5e4   : > { %2719 = vrcp.f32 %v1984_v17 }
 0x5e5   : > { %2721 = vrcp.f32 %v1975_v27 }
 0x5e6   : > { %2723 = vrcp.f32 %v1966_v3 }
 0x5f1   : > { %v2720_v53 = vpop.eup %2719 }
 0x5f2   : > { %v1992_v29 = vmul.f32 0.17677669, %v2720_v53  ;;  %v2722_v39 = vpop.eup %2721 }
 0x5f3   : > { %v1991_v48 = vmul.f32 0.17677669, %v2722_v39  ;;  %v2724_v47 = vpop.eup %2723 }
 0x5f4   : > { %v2007_v13 = vmul.f32 %v2714_v35, %v1992_v29  ;;  %v2008_v4 = vmul.f32 %v2716_v23, %v1992_v29  ;;  %v2005_v54 = vmul.f32 %v2710_v32, %v1992_v29  ;;  %v2006_v58 = vmul.f32 %v2712_v37, %v1992_v29 }
 0x5f5   : > { %v2003_v20 = vmul.f32 %v2702_v41, %v1991_v48  ;;  %v2004_v22 = vmul.f32 %v2706_v42, %v1991_v48  ;;  %v2001_v56 = vmul.f32 %v3589_v24, %v1991_v48  ;;  %v2002_v12 = vmul.f32 %v3591_v43, %v1991_v48  ;;  %v2017_v43 = vld [vmem:[#allocation5] sm:$0xf] }
 0x5f6   : > { %v2016_v11 = vpack.c.bf16 %v2008_v4, %v2007_v13  ;;  %v2015_v34 = vpack.c.bf16 %v2006_v58, %v2005_v54  ;;  %v1990_v50 = vmul.f32 0.17677669, %v2724_v47 }
 0x5f7   : > { %v2014_v40 = vpack.c.bf16 %v2004_v22, %v2003_v20  ;;  %v2013_v25 = vpack.c.bf16 %v2002_v12, %v2001_v56 }
 0x5f8   : > { %2426 = vmatpush3.bf16.msra.mxu1 %v2016_v11  ;;  %v1999_v21 = vmul.f32 %v3597_v45, %v1990_v50  ;;  %v2000_v19 = vmul.f32 %v3600_v55, %v1990_v50  ;;  %v1997_v42 = vmul.f32 %v3585_v30, %v1990_v50  ;;  %v1998_v46 = vmul.f32 %v3587_v28, %v1990_v50  ;;  %v2022_v45 = vpop.permute.xlu0 %2021 }
 0x5f9   : > { %2427 = vmatprep.subr.bf16.mxu1 %v2843_v0 }
 0x5fa   : > { %v2012_v41 = vpack.c.bf16 %v2000_v19, %v1999_v21  ;;  %v2011_v24 = vpack.c.bf16 %v1998_v46, %v1997_v42 }
 0x5fc   : > { %2428 = vmatpush3.bf16.msra.mxu1 %v2015_v34  ;;  %v2078_v57 = vpop.permute.xlu0 %2077 }
 0x5fd   : > { %2429 = vmatprep.subr.bf16.mxu1 %v2843_v0 }
 0x600   : > { %2430 = vmatpush3.bf16.msra.mxu1 %v2014_v40 }
 0x601   : > { %2431 = vmatprep.subr.bf16.mxu1 %v2843_v0 }
 0x604   : > { %2432 = vmatpush3.bf16.msra.mxu1 %v2013_v25 }
 0x605   : > { %2433 = vmatprep.subr.bf16.mxu1 %v2843_v0 }
 0x608   : > { %2434 = vmatpush3.bf16.msra.mxu1 %v2012_v41 }
 0x609   : > { %2435 = vmatprep.subr.bf16.mxu1 %v2843_v0 }
 0x60c   : > { %2436 = vmatpush3.bf16.msra.mxu1 %v2011_v24 }
 0x60d   : > { %2437 = vmatprep.subr.bf16.mxu1 %v2843_v0 }
 0x610   : > { %2438 = vmatpush3.bf16.msra.mxu1 %v2010_v10 }
 0x611   : > { %2439 = vmatprep.subr.bf16.mxu1 %v2843_v0 }
 0x614   : > { %2440 = vmatpush3.bf16.msra.mxu1 %v2009_v16 }
 0x617   : > { %2442 = vmatmul.mubr.bf16.vlgmr.msra.gmra.mxu1 %v2017_v43 }
 0x6d7   : > { %v2058_v55 = vpop.f32.mrf.mxu1 }
 0x6d8   : > { %v2059_v32 = vadd.f32 %v2058_v55, %v2022_v45 }
 0x6d9   : > { %v2443_v37 = vpop.f32.mrf.mxu1 }
 0x6da   : > { %v2064_v30 = vmul.f32 %v2059_v32, %v2059_v32 }
 0x6db   : > { %v2061_v28 = vpop.f32.mrf.mxu1 }
 0x6dc   : > { %v2065_v38 = vrot.slane %v2064_v30, 4 }
 0x6dd   : > { %v2444_v33 = vpop.f32.mrf.mxu1 }
 0x6de   : > { %v2066_v6 = vadd.f32 %v2065_v38, %v2064_v30 }
 0x6e0   : > { %v2067_v35 = vrot.slane %v2066_v6, 2 }
 0x6e2   : > { %v2068_v49 = vadd.f32 %v2067_v35, %v2066_v6 }
 0x6e4   : > { %v2069_v36 = vrot.slane %v2068_v49, 1 }
 0x6e6   : > { %v2070_v23 = vadd.f32 %v2069_v36, %v2068_v49 }
 0x6e8   : > { %v2071_v26 = vmax.f32 %v2070_v23, 1e-24 }
 0x6ea   : > { %2725 = vrsqrt.f32 %v2071_v26 }
 0x6f7   : > { %v2726_v0 = vpop.eup %2725 }
 0x6f8   : > { %v2073_v60 = vmul.f32 %v2726_v0, %v2059_v32 }
 0x6fa   : > { %v2080_v62 = vmul.f32 %v2078_v57, %v2073_v60 }
 0x6fc   : > { %2081 = vst [vmem:[%s3711_s15] sm:$0xff] %v2080_v62 }
 0x6fd PF: > { %s2090_s16 = smul.u32 %s2811_s12, %s2815_s13  ;;  %s2254_s17 = sshll.u32 %s2819_s14, 1 }
 0x6fe   : > { %s3712_s21 = scalar_lea.vmem [#allocation6], %s2988_s24  ;;  %s3713_s19 = sand.u32 1, %s2803_s10  }
 0x6ff   : > { %s2099_s23 = sshll.u32 %s3712_s21, 4  ;;  %s2095_s26 = sadd.s32 %s2254_s17, %s2090_s16  ;;  %s2100_s23 = int_to_ptr.vmem [resolvable:$true] %s2099_s23 }
 0x700   : > { %s2255_s11 = sshll.u32 %s2095_s26, 7  ;;  %s2083_s20 = scalar_lea.sflag [#allocation7], %s3713_s19 }
 0x701   : > { %s2097_s22 = scalar_lea.hbm %s3687_s9, %s2255_s11  ;;  %s2727_s15 = scalar_lea.vmem %s2100_s23, 128 }
 0x702   : > { %p2728_p6 = scmp.ne.s32.totalorder %s2100_s23, %s2727_s15  ;;  %s2846_s0 = smov [#allocation6]  }
 0x703   : > { %s2731_s1 = sshll.u32 %s2846_s0, 4  ;;  %s2732_s1 = int_to_ptr.vmem [resolvable:$false] %s2731_s1 }
 0x704   : > { %p2729_p8 = pnand %p2728_p6, %p2961_p5  ;;  %s2733_s12 = scalar_lea.vmem %s2732_s1, 256 }
 0x705   : > { %p2734_p10 = scmp.lt.s32.totalorder %s2100_s23, %s2732_s1  ;;  %p2735_p11 = scmp.lt.s32.totalorder %s2733_s12, %s2727_s15 }
 0x706   : > { %p2730_p9 = pneg %p2729_p8 }
 0x707   : > { %p2736_p12 = por %p2735_p11, %p2734_p10 }
 0x709   : > { %p2737_p13 = pnand %p2736_p12, %p2730_p9 }
 0x70b   : > { %2740 = shalt.err (!%p2737_p13)
}
 0x70c   : > { %s2741_s13 = scalar_lea.hbm %s2097_s22, 128  ;;  %s2745_s16 = scalar_lea.hbm %s3687_s9, 512 }
 0x70d   : > { %p2742_p0 = scmp.ne.s32.totalorder %s2097_s22, %s2741_s13  ;;  %p2746_p3 = scmp.lt.s32.totalorder %s2097_s22, %s3687_s9 }
 0x70e   : > { %p2747_p4 = scmp.lt.s32.totalorder %s2745_s16, %s2741_s13 }
 0x70f   : > { %p2743_p1 = pnand %p2742_p0, %p2961_p5 }
 0x710   : > { %p2748_p6 = por %p2747_p4, %p2746_p3 }
 0x711   : > { %p2744_p2 = pneg %p2743_p1 }
 0x713   : > { %p2749_p8 = pnand %p2748_p6, %p2744_p2 }
 0x715   : > { %2752 = shalt.err (!%p2749_p8)
}
 0x716   : > { %2464 = dma.vmem_to_hbm [thread:$0]  (%p2961_p5), %s2100_s23, 128, %s2097_s22, %s2083_s20  }
 0x717 PF: > { %p2470_p9 = scmp.ge.s32.totalorder %s2835_s18, 2  ;;  %s2111_s0 = sand.u32 1, %s2799_s30  }
 0x718   : > { %s2112_s1 = scalar_lea.sflag [#allocation7], %s2111_s0 }
 0x719   : > { %p2467_p10 = pnand %p2470_p9, %p2970_p7 }
 0x71b   : > { %p2468_p11 = pneg %p2467_p10 }
 0x71d   : > { %2794 = dma.done.wait (%p2468_p11), %s2112_s1, 128  }
 0x71e   : > { %2796 = vsyncadd (%p2468_p11), %s2112_s1, 4294967168  ;;  %s22_s18 = sadd.s32 1, %s2835_s18   ;;  %s3714_s26 = sld [smem:[#allocation9_spill]] }
 0x71f   : > { %p19_p12 = scmp.ge.s32.totalorder %s22_s18, 10   ;;  %s3715_s11 = sld [smem:[#allocation16_spill]] }
 0x720   : > { %s3716_s12 = sld [smem:[#allocation10_spill]]  ;;  %s3722_s30 = smov %s2803_s10 }
 0x721   : > { %s3717_s13 = sld [smem:[#allocation11_spill]]  ;;  %21 = sbr.rel (!%p19_p12) target bundleno = 9 (0x9), region = 110 }
 0x722   : > { %s3718_s14 = sld [smem:[#allocation12_spill]] }
 0x723   : > { %s3719_s15 = sld [smem:[#allocation13_spill]] }
 0x724   : > { %s3720_s16 = sld [smem:[#allocation14_spill]]  ;;  %s3723_s10 = smov %s3714_s26 }
 0x725   : > { %s3721_s17 = sld [smem:[#allocation15_spill]] }
 0x726   :  { %2117 = vsyncpa [#allocation7], 1 }
 0x727   :  { %2119 = vsyncpa [#allocation7 + $0x1], 1 }

</bundles_post_ra>
